<compile_context>
chip_gen: v7x
topology: tpu7x:2x2x1
jax: 0.10.0
libtpu: 0.0.40
codegen_flags: <defaults>
</compile_context>

<pallas_src>
import functools

import jax
import jax.numpy as jnp
from jax import lax
from jax.experimental import pallas as pl
from jax.experimental.pallas import tpu as pltpu

LN_EPS = 1e-5


def _layer_norm(y, gamma, beta):
    mean = jnp.mean(y, axis=-1, keepdims=True)
    var = jnp.mean(jnp.square(y - mean), axis=-1, keepdims=True)
    return (y - mean) * lax.rsqrt(var + LN_EPS) * gamma + beta


def transformer_block_kernel(
    x_ref, mask_ref,
    wqkv_ref, wu_ref, bu_ref,
    g1_ref, b1_ref,
    wf1_ref, bf1_ref, wf2_ref, bf2_ref,
    g2_ref, b2_ref,
    out_ref,
    *, b_tile, seq, emb, heads, causal, mm_dtype):
    t, e, h = seq, emb, heads
    bt = b_tile * t

    x = x_ref[...].reshape(bt, e)          # (bt, e), f32
    mask2d = mask_ref[0]                   # (t, t)

    def mm(a, w):                          # MXU matmul, f32 accumulation
        return jnp.dot(a.astype(mm_dtype), w.astype(mm_dtype),
                       preferred_element_type=jnp.float32)

    def mm_nt(a, b):                       # contract last dims: (t,e)x(s,e)->(t,s)
        return lax.dot_general(a.astype(mm_dtype), b.astype(mm_dtype),
                               (((1,), (1,)), ((), ())),
                               preferred_element_type=jnp.float32)

    # Fused Q|K|V projection: single (bt, e) @ (e, 3*h*e) matmul.
    qkv = mm(x, wqkv_ref[...])             # (bt, 3*h*e), f32

    # Hoisted mask predicates (computed once, reused for every batch/head).
    neg_mask = mask2d == 0
    if causal:   # mask_(dot, -inf, mask_diagonal=False): strict upper triangle
        row = lax.broadcasted_iota(jnp.int32, (t, t), 0)
        col = lax.broadcasted_iota(jnp.int32, (t, t), 1)
        causal_mask = col > row

    scale = float(e) ** -0.25
    q_off, k_off, v_off = 0, h * e, 2 * h * e

    attended_rows = []
    for bb in range(b_tile):
        rows = slice(bb * t, (bb + 1) * t)
        acc = jnp.zeros((t, e), jnp.float32)
        for hh in range(heads):
            qh = qkv[rows, q_off + hh * e:q_off + (hh + 1) * e] * scale
            kh = qkv[rows, k_off + hh * e:k_off + (hh + 1) * e] * scale
            vh = qkv[rows, v_off + hh * e:v_off + (hh + 1) * e]

            dot = mm_nt(qh, kh)                       # (t, t) scores
            if causal:
                dot = jnp.where(causal_mask, -jnp.inf, dot)
            dot = jnp.where(neg_mask, -1e9, dot)      # masked_fill(mask == 0, -1e9)

            # softmax(dim=2), max-subtracted, denominator via EUP reciprocal
            m = jnp.max(dot, axis=1, keepdims=True)
            p = jnp.exp(dot - m)
            inv = pl.reciprocal(jnp.sum(p, axis=1, keepdims=True), approx=True)
            attn = p * inv

            head_out = mm(attn, vh)                   # (t, e)
            # Unify projection accumulated per head; slicing the *weight* ref
            # is free (no activation concat across lanes).
            acc = acc + mm(head_out, wu_ref[hh * e:(hh + 1) * e, :])
        attended_rows.append(acc)

    attended = jnp.concatenate(attended_rows, axis=0) + bu_ref[0]   # (bt, e)

    # residual + LayerNorm 1   (dropout p=0.0 -> identity)
    y = _layer_norm(attended + x, g1_ref[0], b1_ref[0])

    # feed-forward: Linear -> ReLU -> Linear  (on the whole (bt, e) slab)
    hid = jnp.maximum(mm(y, wf1_ref[...]) + bf1_ref[0], 0.0)
    ff = mm(hid, wf2_ref[...]) + bf2_ref[0]

    # residual + LayerNorm 2
    z = _layer_norm(ff + y, g2_ref[0], b2_ref[0])
    out_ref[...] = z.reshape(b_tile, t, e).astype(out_ref.dtype)


def transformer_block(x, mask, params, *, heads, causal=False,
                      matmul_dtype=jnp.float32, b_tile=None):
    b, t, e = x.shape
    (wq, wk, wv, wu, bu, g1, b1, wf1, bf1, wf2, bf2, g2, b2) = params

    if b_tile is None:
        b_tile = b
    assert b % b_tile == 0, "batch must be divisible by the batch tile"

    # Fuse Q|K|V weights host-side into one (e, 3*h*e) matrix; cast matmul
    # operand weights (not biases / LN params) to the requested matmul dtype.
    wqkv = jnp.concatenate([wq, wk, wv], axis=1).astype(matmul_dtype)
    wu_c = wu.astype(matmul_dtype)
    wf1_c = wf1.astype(matmul_dtype)
    wf2_c = wf2.astype(matmul_dtype)

    kernel = functools.partial(
        transformer_block_kernel, b_tile=b_tile, seq=t, emb=e, heads=heads,
        causal=causal, mm_dtype=matmul_dtype)

    # Weights / small params: fully resident in VMEM, no pipelining and no
    # double-buffer reservation.
    def resident():
        return pl.BlockSpec(memory_space=pltpu.MemorySpace.VMEM)

    ff_dim = wf1.shape[1]
    flops = int(
        2 * b * t * e * (3 * heads * e)            # fused QKV projection
        + 2 * (b * heads * 2 * t * t * e)          # scores + attn @ V
        + b * heads * 2 * t * e * e                # per-head unify accumulate
        + 2 * (2 * b * t * e * ff_dim))            # FFN
    transcendentals = int(b * heads * t * t + b * heads * t + 2 * b * t)
    bytes_accessed = int(
        x.size * x.dtype.itemsize + mask.size * mask.dtype.itemsize
        + sum(w.size * w.dtype.itemsize for w in (wqkv, wu_c, wf1_c, wf2_c))
        + sum(p.size * p.dtype.itemsize
              for p in (bu, g1, b1, bf1, bf2, g2, b2))
        + b * t * e * x.dtype.itemsize)

    out = pl.pallas_call(
        kernel,
        out_shape=jax.ShapeDtypeStruct((b, t, e), x.dtype),
        grid=(b // b_tile,),
        in_specs=[
            pl.BlockSpec((b_tile, t, e), lambda i: (i, 0, 0)),   # x (batch tile)
            pl.BlockSpec((1, t, t), lambda i: (0, 0, 0)),        # mask (shared)
            resident(), resident(), resident(),                  # wqkv, wu, bu
            resident(), resident(),                              # g1, b1
            resident(), resident(), resident(), resident(),      # wf1, bf1, wf2, bf2
            resident(), resident(),                              # g2, b2
        ],
        out_specs=pl.BlockSpec((b_tile, t, e), lambda i: (i, 0, 0)),
        compiler_params=pltpu.CompilerParams(
            dimension_semantics=("parallel",),
            vmem_limit_bytes=32 * 1024 * 1024),
        cost_estimate=pl.CostEstimate(
            flops=flops, transcendentals=transcendentals,
            bytes_accessed=bytes_accessed),
    )(x, mask, wqkv, wu_c, bu, g1, b1, wf1_c, bf1, wf2_c, bf2, g2, b2)
    return out, mask


def reference_block(x, mask, params, *, heads, causal=False):
    """Pure-JAX mirror of the PyTorch forward (for correctness check)."""
    b, t, e = x.shape
    (wq, wk, wv, wu, bu, g1, b1, wf1, bf1, wf2, bf2, g2, b2) = params

    def proj(w):
        y = x @ w                                        # (b, t, h*e)
        y = y.reshape(b, t, heads, e).transpose(0, 2, 1, 3)
        return y.reshape(b * heads, t, e)

    q, k, v = proj(wq), proj(wk), proj(wv)
    q = q / e ** 0.25
    k = k / e ** 0.25
    dot = jnp.einsum('bte,bse->bts', q, k)               # (b*h, t, t)
    if causal:
        row = lax.broadcasted_iota(jnp.int32, (t, t), 0)
        col = lax.broadcasted_iota(jnp.int32, (t, t), 1)
        dot = jnp.where(col > row, -jnp.inf, dot)
    dot = jnp.where(mask == 0, -1e9, dot)
    dot = jax.nn.softmax(dot, axis=2)
    out = jnp.einsum('bts,bse->bte', dot, v)
    out = out.reshape(b, heads, t, e).transpose(0, 2, 1, 3).reshape(b, t, heads * e)
    attended = out @ wu + bu[0]

    def ln(y, g, bb):
        m = y.mean(-1, keepdims=True)
        var = ((y - m) ** 2).mean(-1, keepdims=True)
        return (y - m) / jnp.sqrt(var + LN_EPS) * g[0] + bb[0]

    y = ln(attended + x, g1, b1)
    hid = jnp.maximum(y @ wf1 + bf1[0], 0.0)
    ff = hid @ wf2 + bf2[0]
    return ln(ff + y, g2, b2)


def init_params(key, emb, heads, ff_hidden_mult=4):
    ks = jax.random.split(key, 8)
    s = 0.1
    wq = jax.random.normal(ks[0], (emb, emb * heads), jnp.float32) * s
    wk = jax.random.normal(ks[1], (emb, emb * heads), jnp.float32) * s
    wv = jax.random.normal(ks[2], (emb, emb * heads), jnp.float32) * s
    wu = jax.random.normal(ks[3], (heads * emb, emb), jnp.float32) * s
    bu = jax.random.normal(ks[4], (1, emb), jnp.float32) * s
    g1 = jnp.ones((1, emb), jnp.float32)
    b1 = jnp.zeros((1, emb), jnp.float32)
    wf1 = jax.random.normal(ks[5], (emb, ff_hidden_mult * emb), jnp.float32) * s
    bf1 = jax.random.normal(ks[6], (1, ff_hidden_mult * emb), jnp.float32) * s
    wf2 = jax.random.normal(ks[7], (ff_hidden_mult * emb, emb), jnp.float32) * s
    bf2 = jnp.zeros((1, emb), jnp.float32)
    g2 = jnp.ones((1, emb), jnp.float32)
    b2 = jnp.zeros((1, emb), jnp.float32)
    return (wq, wk, wv, wu, bu, g1, b1, wf1, bf1, wf2, bf2, g2, b2)


if __name__ == "__main__":
    B, T, EMB, HEADS = 2, 8, 32, 4
    key = jax.random.PRNGKey(0)
    kx, kp, km = jax.random.split(key, 3)

    x = jax.random.normal(kx, (B, T, EMB), jnp.float32)
    # external mask broadcastable to (b*h, t, t); mostly ones, a few zeros
    mask = (jax.random.uniform(km, (1, T, T)) > 0.1).astype(jnp.float32)
    params = init_params(kp, EMB, HEADS)

    ref = reference_block(x, mask, params, heads=HEADS, causal=False)

    # f32 matmul operands: tight check against the pure-JAX reference.
    out, mask_out = transformer_block(
        x, mask, params, heads=HEADS, causal=False, matmul_dtype=jnp.float32)
    out = jax.block_until_ready(out)
    assert out.shape == (B, T, EMB)
    err = float(jnp.max(jnp.abs(out - ref)))
    assert jnp.allclose(out, ref, atol=5e-3, rtol=5e-3), err

    # bf16 matmul operands (v6e/v7x MXU fast path): looser numeric check.
    out_bf16, _ = transformer_block(
        x, mask, params, heads=HEADS, causal=False, matmul_dtype=jnp.bfloat16)
    out_bf16 = jax.block_until_ready(out_bf16)
    assert bool(jnp.all(jnp.isfinite(out_bf16)))
    assert jnp.allclose(out_bf16, ref, atol=1e-1, rtol=1e-1)

    print("KERNEL_OK")
</pallas_src>

<mosaic_0001>
module attributes {stable_mosaic.version = 11 : i64} {
  func.func @transformer_block_kernel(%arg0: i32, %arg1: memref<2x8x32xf32, #tpu.memory_space<vmem>>, %arg2: memref<1x8x8xf32, #tpu.memory_space<vmem>>, %arg3: memref<32x384xf32, #tpu.memory_space<vmem>>, %arg4: memref<128x32xf32, #tpu.memory_space<vmem>>, %arg5: memref<1x32xf32, #tpu.memory_space<vmem>>, %arg6: memref<1x32xf32, #tpu.memory_space<vmem>>, %arg7: memref<1x32xf32, #tpu.memory_space<vmem>>, %arg8: memref<32x128xf32, #tpu.memory_space<vmem>>, %arg9: memref<1x128xf32, #tpu.memory_space<vmem>>, %arg10: memref<128x32xf32, #tpu.memory_space<vmem>>, %arg11: memref<1x32xf32, #tpu.memory_space<vmem>>, %arg12: memref<1x32xf32, #tpu.memory_space<vmem>>, %arg13: memref<1x32xf32, #tpu.memory_space<vmem>>, %arg14: memref<2x8x32xf32, #tpu.memory_space<vmem>>) attributes {dimension_semantics = [#tpu.dimension_semantics<parallel>], iteration_bounds = array<i64: 1>, scalar_prefetch = 0 : i64, scratch_operands = 0 : i64, tpu.core_type = #tpu.core_type<tc>, window_params = [{transform_indices = @transform_0, window_bounds = array<i64: 2, 8, 32>}, {pipeline_mode = #tpu.pipeline_mode<synchronous>, transform_indices = @transform_1, window_bounds = array<i64: 1, 8, 8>}, {pipeline_mode = #tpu.pipeline_mode<synchronous>, transform_indices = @transform_2, window_bounds = array<i64: 32, 384>}, {pipeline_mode = #tpu.pipeline_mode<synchronous>, transform_indices = @transform_3, window_bounds = array<i64: 128, 32>}, {pipeline_mode = #tpu.pipeline_mode<synchronous>, transform_indices = @transform_4, window_bounds = array<i64: 1, 32>}, {pipeline_mode = #tpu.pipeline_mode<synchronous>, transform_indices = @transform_5, window_bounds = array<i64: 1, 32>}, {pipeline_mode = #tpu.pipeline_mode<synchronous>, transform_indices = @transform_6, window_bounds = array<i64: 1, 32>}, {pipeline_mode = #tpu.pipeline_mode<synchronous>, transform_indices = @transform_7, window_bounds = array<i64: 32, 128>}, {pipeline_mode = #tpu.pipeline_mode<synchronous>, transform_indices = @transform_8, window_bounds = array<i64: 1, 128>}, {pipeline_mode = #tpu.pipeline_mode<synchronous>, transform_indices = @transform_9, window_bounds = array<i64: 128, 32>}, {pipeline_mode = #tpu.pipeline_mode<synchronous>, transform_indices = @transform_10, window_bounds = array<i64: 1, 32>}, {pipeline_mode = #tpu.pipeline_mode<synchronous>, transform_indices = @transform_11, window_bounds = array<i64: 1, 32>}, {pipeline_mode = #tpu.pipeline_mode<synchronous>, transform_indices = @transform_12, window_bounds = array<i64: 1, 32>}, {transform_indices = @transform_13, window_bounds = array<i64: 2, 8, 32>}]} {
    %c0 = arith.constant 0 : index
    %c0_0 = arith.constant 0 : index
    %c0_1 = arith.constant 0 : index
    %0 = vector.load %arg1[%c0, %c0_0, %c0_1] : memref<2x8x32xf32, #tpu.memory_space<vmem>>, vector<2x8x32xf32>
    %1 = vector.shape_cast %0 : vector<2x8x32xf32> to vector<16x32xf32>
    %c0_2 = arith.constant 0 : index
    %c0_3 = arith.constant 0 : index
    %c0_4 = arith.constant 0 : index
    %2 = vector.load %arg2[%c0_2, %c0_3, %c0_4] : memref<1x8x8xf32, #tpu.memory_space<vmem>>, vector<1x8x8xf32>
    %3 = vector.shape_cast %2 : vector<1x8x8xf32> to vector<8x8xf32>
    %c0_5 = arith.constant 0 : index
    %c0_6 = arith.constant 0 : index
    %4 = vector.load %arg3[%c0_5, %c0_6] : memref<32x384xf32, #tpu.memory_space<vmem>>, vector<32x384xf32>
    %cst = arith.constant dense<0.000000e+00> : vector<16x384xf32>
    %5 = tpu.matmul %1, %4, %cst {dimension_numbers = #tpu.dot_dimension_numbers<[1], [0], [0], [1], [0, 0, 1, 1], [], []>} : vector<16x32xf32>, vector<32x384xf32>, vector<16x384xf32> -> vector<16x384xf32>
    %cst_7 = arith.constant 0.000000e+00 : f32
    %6 = vector.broadcast %cst_7 : f32 to vector<8x8xf32>
    %7 = arith.cmpf oeq, %3, %6 : vector<8x8xf32>
    %cst_8 = arith.constant 0.000000e+00 : f32
    %8 = vector.broadcast %cst_8 : f32 to vector<8x32xf32>
    %9 = vector.extract_strided_slice %5 {offsets = [0, 0], sizes = [8, 32], strides = [1, 1]} : vector<16x384xf32> to vector<8x32xf32>
    %cst_9 = arith.constant 0.420448214 : f32
    %10 = vector.broadcast %cst_9 : f32 to vector<8x32xf32>
    %11 = arith.mulf %9, %10 : vector<8x32xf32>
    %12 = vector.extract_strided_slice %5 {offsets = [0, 128], sizes = [8, 32], strides = [1, 1]} : vector<16x384xf32> to vector<8x32xf32>
    %cst_10 = arith.constant 0.420448214 : f32
    %13 = vector.broadcast %cst_10 : f32 to vector<8x32xf32>
    %14 = arith.mulf %12, %13 : vector<8x32xf32>
    %15 = vector.extract_strided_slice %5 {offsets = [0, 256], sizes = [8, 32], strides = [1, 1]} : vector<16x384xf32> to vector<8x32xf32>
    %cst_11 = arith.constant dense<0.000000e+00> : vector<8x8xf32>
    %16 = tpu.matmul %11, %14, %cst_11 {dimension_numbers = #tpu.dot_dimension_numbers<[1], [1], [0], [0], [0, 0, 1, 0], [], []>} : vector<8x32xf32>, vector<8x32xf32>, vector<8x8xf32> -> vector<8x8xf32>
    %cst_12 = arith.constant -1.000000e+09 : f32
    %17 = vector.broadcast %cst_12 : f32 to vector<8x8xf32>
    %18 = arith.select %7, %17, %16 : vector<8x8xi1>, vector<8x8xf32>
    %cst_13 = arith.constant dense<0xFF800000> : vector<8xf32>
    %19 = vector.multi_reduction <maximumf>, %18, %cst_13 [1] : vector<8x8xf32> to vector<8xf32>
    %20 = vector.shape_cast %19 : vector<8xf32> to vector<8x1xf32>
    %21 = vector.broadcast %20 : vector<8x1xf32> to vector<8x8xf32>
    %22 = arith.subf %18, %21 : vector<8x8xf32>
    %23 = math.exp %22 : vector<8x8xf32>
    %cst_14 = arith.constant dense<0.000000e+00> : vector<8xf32>
    %24 = vector.multi_reduction <add>, %23, %cst_14 [1] : vector<8x8xf32> to vector<8xf32>
    %25 = vector.shape_cast %24 : vector<8xf32> to vector<8x1xf32>
    %26 = tpu.reciprocal %25 {approx = true} : vector<8x1xf32> -> vector<8x1xf32>
    %27 = vector.broadcast %26 : vector<8x1xf32> to vector<8x8xf32>
    %28 = arith.mulf %23, %27 : vector<8x8xf32>
    %cst_15 = arith.constant dense<0.000000e+00> : vector<8x32xf32>
    %29 = tpu.matmul %28, %15, %cst_15 {dimension_numbers = #tpu.dot_dimension_numbers<[1], [0], [0], [1], [0, 0, 1, 1], [], []>} : vector<8x8xf32>, vector<8x32xf32>, vector<8x32xf32> -> vector<8x32xf32>
    %c0_16 = arith.constant 0 : index
    %c0_17 = arith.constant 0 : index
    %30 = vector.load %arg4[%c0_16, %c0_17] : memref<128x32xf32, #tpu.memory_space<vmem>>, vector<32x32xf32>
    %cst_18 = arith.constant dense<0.000000e+00> : vector<8x32xf32>
    %31 = tpu.matmul %29, %30, %cst_18 {dimension_numbers = #tpu.dot_dimension_numbers<[1], [0], [0], [1], [0, 0, 1, 1], [], []>} : vector<8x32xf32>, vector<32x32xf32>, vector<8x32xf32> -> vector<8x32xf32>
    %32 = arith.addf %8, %31 : vector<8x32xf32>
    %33 = vector.extract_strided_slice %5 {offsets = [0, 32], sizes = [8, 32], strides = [1, 1]} : vector<16x384xf32> to vector<8x32xf32>
    %cst_19 = arith.constant 0.420448214 : f32
    %34 = vector.broadcast %cst_19 : f32 to vector<8x32xf32>
    %35 = arith.mulf %33, %34 : vector<8x32xf32>
    %36 = vector.extract_strided_slice %5 {offsets = [0, 160], sizes = [8, 32], strides = [1, 1]} : vector<16x384xf32> to vector<8x32xf32>
    %cst_20 = arith.constant 0.420448214 : f32
    %37 = vector.broadcast %cst_20 : f32 to vector<8x32xf32>
    %38 = arith.mulf %36, %37 : vector<8x32xf32>
    %39 = vector.extract_strided_slice %5 {offsets = [0, 288], sizes = [8, 32], strides = [1, 1]} : vector<16x384xf32> to vector<8x32xf32>
    %cst_21 = arith.constant dense<0.000000e+00> : vector<8x8xf32>
    %40 = tpu.matmul %35, %38, %cst_21 {dimension_numbers = #tpu.dot_dimension_numbers<[1], [1], [0], [0], [0, 0, 1, 0], [], []>} : vector<8x32xf32>, vector<8x32xf32>, vector<8x8xf32> -> vector<8x8xf32>
    %cst_22 = arith.constant -1.000000e+09 : f32
    %41 = vector.broadcast %cst_22 : f32 to vector<8x8xf32>
    %42 = arith.select %7, %41, %40 : vector<8x8xi1>, vector<8x8xf32>
    %cst_23 = arith.constant dense<0xFF800000> : vector<8xf32>
    %43 = vector.multi_reduction <maximumf>, %42, %cst_23 [1] : vector<8x8xf32> to vector<8xf32>
    %44 = vector.shape_cast %43 : vector<8xf32> to vector<8x1xf32>
    %45 = vector.broadcast %44 : vector<8x1xf32> to vector<8x8xf32>
    %46 = arith.subf %42, %45 : vector<8x8xf32>
    %47 = math.exp %46 : vector<8x8xf32>
    %cst_24 = arith.constant dense<0.000000e+00> : vector<8xf32>
    %48 = vector.multi_reduction <add>, %47, %cst_24 [1] : vector<8x8xf32> to vector<8xf32>
    %49 = vector.shape_cast %48 : vector<8xf32> to vector<8x1xf32>
    %50 = tpu.reciprocal %49 {approx = true} : vector<8x1xf32> -> vector<8x1xf32>
    %51 = vector.broadcast %50 : vector<8x1xf32> to vector<8x8xf32>
    %52 = arith.mulf %47, %51 : vector<8x8xf32>
    %cst_25 = arith.constant dense<0.000000e+00> : vector<8x32xf32>
    %53 = tpu.matmul %52, %39, %cst_25 {dimension_numbers = #tpu.dot_dimension_numbers<[1], [0], [0], [1], [0, 0, 1, 1], [], []>} : vector<8x8xf32>, vector<8x32xf32>, vector<8x32xf32> -> vector<8x32xf32>
    %c32 = arith.constant 32 : index
    %c0_26 = arith.constant 0 : index
    %54 = vector.load %arg4[%c32, %c0_26] : memref<128x32xf32, #tpu.memory_space<vmem>>, vector<32x32xf32>
    %cst_27 = arith.constant dense<0.000000e+00> : vector<8x32xf32>
    %55 = tpu.matmul %53, %54, %cst_27 {dimension_numbers = #tpu.dot_dimension_numbers<[1], [0], [0], [1], [0, 0, 1, 1], [], []>} : vector<8x32xf32>, vector<32x32xf32>, vector<8x32xf32> -> vector<8x32xf32>
    %56 = arith.addf %32, %55 : vector<8x32xf32>
    %57 = vector.extract_strided_slice %5 {offsets = [0, 64], sizes = [8, 32], strides = [1, 1]} : vector<16x384xf32> to vector<8x32xf32>
    %cst_28 = arith.constant 0.420448214 : f32
    %58 = vector.broadcast %cst_28 : f32 to vector<8x32xf32>
    %59 = arith.mulf %57, %58 : vector<8x32xf32>
    %60 = vector.extract_strided_slice %5 {offsets = [0, 192], sizes = [8, 32], strides = [1, 1]} : vector<16x384xf32> to vector<8x32xf32>
    %cst_29 = arith.constant 0.420448214 : f32
    %61 = vector.broadcast %cst_29 : f32 to vector<8x32xf32>
    %62 = arith.mulf %60, %61 : vector<8x32xf32>
    %63 = vector.extract_strided_slice %5 {offsets = [0, 320], sizes = [8, 32], strides = [1, 1]} : vector<16x384xf32> to vector<8x32xf32>
    %cst_30 = arith.constant dense<0.000000e+00> : vector<8x8xf32>
    %64 = tpu.matmul %59, %62, %cst_30 {dimension_numbers = #tpu.dot_dimension_numbers<[1], [1], [0], [0], [0, 0, 1, 0], [], []>} : vector<8x32xf32>, vector<8x32xf32>, vector<8x8xf32> -> vector<8x8xf32>
    %cst_31 = arith.constant -1.000000e+09 : f32
    %65 = vector.broadcast %cst_31 : f32 to vector<8x8xf32>
    %66 = arith.select %7, %65, %64 : vector<8x8xi1>, vector<8x8xf32>
    %cst_32 = arith.constant dense<0xFF800000> : vector<8xf32>
    %67 = vector.multi_reduction <maximumf>, %66, %cst_32 [1] : vector<8x8xf32> to vector<8xf32>
    %68 = vector.shape_cast %67 : vector<8xf32> to vector<8x1xf32>
    %69 = vector.broadcast %68 : vector<8x1xf32> to vector<8x8xf32>
    %70 = arith.subf %66, %69 : vector<8x8xf32>
    %71 = math.exp %70 : vector<8x8xf32>
    %cst_33 = arith.constant dense<0.000000e+00> : vector<8xf32>
    %72 = vector.multi_reduction <add>, %71, %cst_33 [1] : vector<8x8xf32> to vector<8xf32>
    %73 = vector.shape_cast %72 : vector<8xf32> to vector<8x1xf32>
    %74 = tpu.reciprocal %73 {approx = true} : vector<8x1xf32> -> vector<8x1xf32>
    %75 = vector.broadcast %74 : vector<8x1xf32> to vector<8x8xf32>
    %76 = arith.mulf %71, %75 : vector<8x8xf32>
    %cst_34 = arith.constant dense<0.000000e+00> : vector<8x32xf32>
    %77 = tpu.matmul %76, %63, %cst_34 {dimension_numbers = #tpu.dot_dimension_numbers<[1], [0], [0], [1], [0, 0, 1, 1], [], []>} : vector<8x8xf32>, vector<8x32xf32>, vector<8x32xf32> -> vector<8x32xf32>
    %c64 = arith.constant 64 : index
    %c0_35 = arith.constant 0 : index
    %78 = vector.load %arg4[%c64, %c0_35] : memref<128x32xf32, #tpu.memory_space<vmem>>, vector<32x32xf32>
    %cst_36 = arith.constant dense<0.000000e+00> : vector<8x32xf32>
    %79 = tpu.matmul %77, %78, %cst_36 {dimension_numbers = #tpu.dot_dimension_numbers<[1], [0], [0], [1], [0, 0, 1, 1], [], []>} : vector<8x32xf32>, vector<32x32xf32>, vector<8x32xf32> -> vector<8x32xf32>
    %80 = arith.addf %56, %79 : vector<8x32xf32>
    %81 = vector.extract_strided_slice %5 {offsets = [0, 96], sizes = [8, 32], strides = [1, 1]} : vector<16x384xf32> to vector<8x32xf32>
    %cst_37 = arith.constant 0.420448214 : f32
    %82 = vector.broadcast %cst_37 : f32 to vector<8x32xf32>
    %83 = arith.mulf %81, %82 : vector<8x32xf32>
    %84 = vector.extract_strided_slice %5 {offsets = [0, 224], sizes = [8, 32], strides = [1, 1]} : vector<16x384xf32> to vector<8x32xf32>
    %cst_38 = arith.constant 0.420448214 : f32
    %85 = vector.broadcast %cst_38 : f32 to vector<8x32xf32>
    %86 = arith.mulf %84, %85 : vector<8x32xf32>
    %87 = vector.extract_strided_slice %5 {offsets = [0, 352], sizes = [8, 32], strides = [1, 1]} : vector<16x384xf32> to vector<8x32xf32>
    %cst_39 = arith.constant dense<0.000000e+00> : vector<8x8xf32>
    %88 = tpu.matmul %83, %86, %cst_39 {dimension_numbers = #tpu.dot_dimension_numbers<[1], [1], [0], [0], [0, 0, 1, 0], [], []>} : vector<8x32xf32>, vector<8x32xf32>, vector<8x8xf32> -> vector<8x8xf32>
    %cst_40 = arith.constant -1.000000e+09 : f32
    %89 = vector.broadcast %cst_40 : f32 to vector<8x8xf32>
    %90 = arith.select %7, %89, %88 : vector<8x8xi1>, vector<8x8xf32>
    %cst_41 = arith.constant dense<0xFF800000> : vector<8xf32>
    %91 = vector.multi_reduction <maximumf>, %90, %cst_41 [1] : vector<8x8xf32> to vector<8xf32>
    %92 = vector.shape_cast %91 : vector<8xf32> to vector<8x1xf32>
    %93 = vector.broadcast %92 : vector<8x1xf32> to vector<8x8xf32>
    %94 = arith.subf %90, %93 : vector<8x8xf32>
    %95 = math.exp %94 : vector<8x8xf32>
    %cst_42 = arith.constant dense<0.000000e+00> : vector<8xf32>
    %96 = vector.multi_reduction <add>, %95, %cst_42 [1] : vector<8x8xf32> to vector<8xf32>
    %97 = vector.shape_cast %96 : vector<8xf32> to vector<8x1xf32>
    %98 = tpu.reciprocal %97 {approx = true} : vector<8x1xf32> -> vector<8x1xf32>
    %99 = vector.broadcast %98 : vector<8x1xf32> to vector<8x8xf32>
    %100 = arith.mulf %95, %99 : vector<8x8xf32>
    %cst_43 = arith.constant dense<0.000000e+00> : vector<8x32xf32>
    %101 = tpu.matmul %100, %87, %cst_43 {dimension_numbers = #tpu.dot_dimension_numbers<[1], [0], [0], [1], [0, 0, 1, 1], [], []>} : vector<8x8xf32>, vector<8x32xf32>, vector<8x32xf32> -> vector<8x32xf32>
    %c96 = arith.constant 96 : index
    %c0_44 = arith.constant 0 : index
    %102 = vector.load %arg4[%c96, %c0_44] : memref<128x32xf32, #tpu.memory_space<vmem>>, vector<32x32xf32>
    %cst_45 = arith.constant dense<0.000000e+00> : vector<8x32xf32>
    %103 = tpu.matmul %101, %102, %cst_45 {dimension_numbers = #tpu.dot_dimension_numbers<[1], [0], [0], [1], [0, 0, 1, 1], [], []>} : vector<8x32xf32>, vector<32x32xf32>, vector<8x32xf32> -> vector<8x32xf32>
    %104 = arith.addf %80, %103 : vector<8x32xf32>
    %cst_46 = arith.constant 0.000000e+00 : f32
    %105 = vector.broadcast %cst_46 : f32 to vector<8x32xf32>
    %106 = vector.extract_strided_slice %5 {offsets = [8, 0], sizes = [8, 32], strides = [1, 1]} : vector<16x384xf32> to vector<8x32xf32>
    %cst_47 = arith.constant 0.420448214 : f32
    %107 = vector.broadcast %cst_47 : f32 to vector<8x32xf32>
    %108 = arith.mulf %106, %107 : vector<8x32xf32>
    %109 = vector.extract_strided_slice %5 {offsets = [8, 128], sizes = [8, 32], strides = [1, 1]} : vector<16x384xf32> to vector<8x32xf32>
    %cst_48 = arith.constant 0.420448214 : f32
    %110 = vector.broadcast %cst_48 : f32 to vector<8x32xf32>
    %111 = arith.mulf %109, %110 : vector<8x32xf32>
    %112 = vector.extract_strided_slice %5 {offsets = [8, 256], sizes = [8, 32], strides = [1, 1]} : vector<16x384xf32> to vector<8x32xf32>
    %cst_49 = arith.constant dense<0.000000e+00> : vector<8x8xf32>
    %113 = tpu.matmul %108, %111, %cst_49 {dimension_numbers = #tpu.dot_dimension_numbers<[1], [1], [0], [0], [0, 0, 1, 0], [], []>} : vector<8x32xf32>, vector<8x32xf32>, vector<8x8xf32> -> vector<8x8xf32>
    %cst_50 = arith.constant -1.000000e+09 : f32
    %114 = vector.broadcast %cst_50 : f32 to vector<8x8xf32>
    %115 = arith.select %7, %114, %113 : vector<8x8xi1>, vector<8x8xf32>
    %cst_51 = arith.constant dense<0xFF800000> : vector<8xf32>
    %116 = vector.multi_reduction <maximumf>, %115, %cst_51 [1] : vector<8x8xf32> to vector<8xf32>
    %117 = vector.shape_cast %116 : vector<8xf32> to vector<8x1xf32>
    %118 = vector.broadcast %117 : vector<8x1xf32> to vector<8x8xf32>
    %119 = arith.subf %115, %118 : vector<8x8xf32>
    %120 = math.exp %119 : vector<8x8xf32>
    %cst_52 = arith.constant dense<0.000000e+00> : vector<8xf32>
    %121 = vector.multi_reduction <add>, %120, %cst_52 [1] : vector<8x8xf32> to vector<8xf32>
    %122 = vector.shape_cast %121 : vector<8xf32> to vector<8x1xf32>
    %123 = tpu.reciprocal %122 {approx = true} : vector<8x1xf32> -> vector<8x1xf32>
    %124 = vector.broadcast %123 : vector<8x1xf32> to vector<8x8xf32>
    %125 = arith.mulf %120, %124 : vector<8x8xf32>
    %cst_53 = arith.constant dense<0.000000e+00> : vector<8x32xf32>
    %126 = tpu.matmul %125, %112, %cst_53 {dimension_numbers = #tpu.dot_dimension_numbers<[1], [0], [0], [1], [0, 0, 1, 1], [], []>} : vector<8x8xf32>, vector<8x32xf32>, vector<8x32xf32> -> vector<8x32xf32>
    %c0_54 = arith.constant 0 : index
    %c0_55 = arith.constant 0 : index
    %127 = vector.load %arg4[%c0_54, %c0_55] : memref<128x32xf32, #tpu.memory_space<vmem>>, vector<32x32xf32>
    %cst_56 = arith.constant dense<0.000000e+00> : vector<8x32xf32>
    %128 = tpu.matmul %126, %127, %cst_56 {dimension_numbers = #tpu.dot_dimension_numbers<[1], [0], [0], [1], [0, 0, 1, 1], [], []>} : vector<8x32xf32>, vector<32x32xf32>, vector<8x32xf32> -> vector<8x32xf32>
    %129 = arith.addf %105, %128 : vector<8x32xf32>
    %130 = vector.extract_strided_slice %5 {offsets = [8, 32], sizes = [8, 32], strides = [1, 1]} : vector<16x384xf32> to vector<8x32xf32>
    %cst_57 = arith.constant 0.420448214 : f32
    %131 = vector.broadcast %cst_57 : f32 to vector<8x32xf32>
    %132 = arith.mulf %130, %131 : vector<8x32xf32>
    %133 = vector.extract_strided_slice %5 {offsets = [8, 160], sizes = [8, 32], strides = [1, 1]} : vector<16x384xf32> to vector<8x32xf32>
    %cst_58 = arith.constant 0.420448214 : f32
    %134 = vector.broadcast %cst_58 : f32 to vector<8x32xf32>
    %135 = arith.mulf %133, %134 : vector<8x32xf32>
    %136 = vector.extract_strided_slice %5 {offsets = [8, 288], sizes = [8, 32], strides = [1, 1]} : vector<16x384xf32> to vector<8x32xf32>
    %cst_59 = arith.constant dense<0.000000e+00> : vector<8x8xf32>
    %137 = tpu.matmul %132, %135, %cst_59 {dimension_numbers = #tpu.dot_dimension_numbers<[1], [1], [0], [0], [0, 0, 1, 0], [], []>} : vector<8x32xf32>, vector<8x32xf32>, vector<8x8xf32> -> vector<8x8xf32>
    %cst_60 = arith.constant -1.000000e+09 : f32
    %138 = vector.broadcast %cst_60 : f32 to vector<8x8xf32>
    %139 = arith.select %7, %138, %137 : vector<8x8xi1>, vector<8x8xf32>
    %cst_61 = arith.constant dense<0xFF800000> : vector<8xf32>
    %140 = vector.multi_reduction <maximumf>, %139, %cst_61 [1] : vector<8x8xf32> to vector<8xf32>
    %141 = vector.shape_cast %140 : vector<8xf32> to vector<8x1xf32>
    %142 = vector.broadcast %141 : vector<8x1xf32> to vector<8x8xf32>
    %143 = arith.subf %139, %142 : vector<8x8xf32>
    %144 = math.exp %143 : vector<8x8xf32>
    %cst_62 = arith.constant dense<0.000000e+00> : vector<8xf32>
    %145 = vector.multi_reduction <add>, %144, %cst_62 [1] : vector<8x8xf32> to vector<8xf32>
    %146 = vector.shape_cast %145 : vector<8xf32> to vector<8x1xf32>
    %147 = tpu.reciprocal %146 {approx = true} : vector<8x1xf32> -> vector<8x1xf32>
    %148 = vector.broadcast %147 : vector<8x1xf32> to vector<8x8xf32>
    %149 = arith.mulf %144, %148 : vector<8x8xf32>
    %cst_63 = arith.constant dense<0.000000e+00> : vector<8x32xf32>
    %150 = tpu.matmul %149, %136, %cst_63 {dimension_numbers = #tpu.dot_dimension_numbers<[1], [0], [0], [1], [0, 0, 1, 1], [], []>} : vector<8x8xf32>, vector<8x32xf32>, vector<8x32xf32> -> vector<8x32xf32>
    %c32_64 = arith.constant 32 : index
    %c0_65 = arith.constant 0 : index
    %151 = vector.load %arg4[%c32_64, %c0_65] : memref<128x32xf32, #tpu.memory_space<vmem>>, vector<32x32xf32>
    %cst_66 = arith.constant dense<0.000000e+00> : vector<8x32xf32>
    %152 = tpu.matmul %150, %151, %cst_66 {dimension_numbers = #tpu.dot_dimension_numbers<[1], [0], [0], [1], [0, 0, 1, 1], [], []>} : vector<8x32xf32>, vector<32x32xf32>, vector<8x32xf32> -> vector<8x32xf32>
    %153 = arith.addf %129, %152 : vector<8x32xf32>
    %154 = vector.extract_strided_slice %5 {offsets = [8, 64], sizes = [8, 32], strides = [1, 1]} : vector<16x384xf32> to vector<8x32xf32>
    %cst_67 = arith.constant 0.420448214 : f32
    %155 = vector.broadcast %cst_67 : f32 to vector<8x32xf32>
    %156 = arith.mulf %154, %155 : vector<8x32xf32>
    %157 = vector.extract_strided_slice %5 {offsets = [8, 192], sizes = [8, 32], strides = [1, 1]} : vector<16x384xf32> to vector<8x32xf32>
    %cst_68 = arith.constant 0.420448214 : f32
    %158 = vector.broadcast %cst_68 : f32 to vector<8x32xf32>
    %159 = arith.mulf %157, %158 : vector<8x32xf32>
    %160 = vector.extract_strided_slice %5 {offsets = [8, 320], sizes = [8, 32], strides = [1, 1]} : vector<16x384xf32> to vector<8x32xf32>
    %cst_69 = arith.constant dense<0.000000e+00> : vector<8x8xf32>
    %161 = tpu.matmul %156, %159, %cst_69 {dimension_numbers = #tpu.dot_dimension_numbers<[1], [1], [0], [0], [0, 0, 1, 0], [], []>} : vector<8x32xf32>, vector<8x32xf32>, vector<8x8xf32> -> vector<8x8xf32>
    %cst_70 = arith.constant -1.000000e+09 : f32
    %162 = vector.broadcast %cst_70 : f32 to vector<8x8xf32>
    %163 = arith.select %7, %162, %161 : vector<8x8xi1>, vector<8x8xf32>
    %cst_71 = arith.constant dense<0xFF800000> : vector<8xf32>
    %164 = vector.multi_reduction <maximumf>, %163, %cst_71 [1] : vector<8x8xf32> to vector<8xf32>
    %165 = vector.shape_cast %164 : vector<8xf32> to vector<8x1xf32>
    %166 = vector.broadcast %165 : vector<8x1xf32> to vector<8x8xf32>
    %167 = arith.subf %163, %166 : vector<8x8xf32>
    %168 = math.exp %167 : vector<8x8xf32>
    %cst_72 = arith.constant dense<0.000000e+00> : vector<8xf32>
    %169 = vector.multi_reduction <add>, %168, %cst_72 [1] : vector<8x8xf32> to vector<8xf32>
    %170 = vector.shape_cast %169 : vector<8xf32> to vector<8x1xf32>
    %171 = tpu.reciprocal %170 {approx = true} : vector<8x1xf32> -> vector<8x1xf32>
    %172 = vector.broadcast %171 : vector<8x1xf32> to vector<8x8xf32>
    %173 = arith.mulf %168, %172 : vector<8x8xf32>
    %cst_73 = arith.constant dense<0.000000e+00> : vector<8x32xf32>
    %174 = tpu.matmul %173, %160, %cst_73 {dimension_numbers = #tpu.dot_dimension_numbers<[1], [0], [0], [1], [0, 0, 1, 1], [], []>} : vector<8x8xf32>, vector<8x32xf32>, vector<8x32xf32> -> vector<8x32xf32>
    %c64_74 = arith.constant 64 : index
    %c0_75 = arith.constant 0 : index
    %175 = vector.load %arg4[%c64_74, %c0_75] : memref<128x32xf32, #tpu.memory_space<vmem>>, vector<32x32xf32>
    %cst_76 = arith.constant dense<0.000000e+00> : vector<8x32xf32>
    %176 = tpu.matmul %174, %175, %cst_76 {dimension_numbers = #tpu.dot_dimension_numbers<[1], [0], [0], [1], [0, 0, 1, 1], [], []>} : vector<8x32xf32>, vector<32x32xf32>, vector<8x32xf32> -> vector<8x32xf32>
    %177 = arith.addf %153, %176 : vector<8x32xf32>
    %178 = vector.extract_strided_slice %5 {offsets = [8, 96], sizes = [8, 32], strides = [1, 1]} : vector<16x384xf32> to vector<8x32xf32>
    %cst_77 = arith.constant 0.420448214 : f32
    %179 = vector.broadcast %cst_77 : f32 to vector<8x32xf32>
    %180 = arith.mulf %178, %179 : vector<8x32xf32>
    %181 = vector.extract_strided_slice %5 {offsets = [8, 224], sizes = [8, 32], strides = [1, 1]} : vector<16x384xf32> to vector<8x32xf32>
    %cst_78 = arith.constant 0.420448214 : f32
    %182 = vector.broadcast %cst_78 : f32 to vector<8x32xf32>
    %183 = arith.mulf %181, %182 : vector<8x32xf32>
    %184 = vector.extract_strided_slice %5 {offsets = [8, 352], sizes = [8, 32], strides = [1, 1]} : vector<16x384xf32> to vector<8x32xf32>
    %cst_79 = arith.constant dense<0.000000e+00> : vector<8x8xf32>
    %185 = tpu.matmul %180, %183, %cst_79 {dimension_numbers = #tpu.dot_dimension_numbers<[1], [1], [0], [0], [0, 0, 1, 0], [], []>} : vector<8x32xf32>, vector<8x32xf32>, vector<8x8xf32> -> vector<8x8xf32>
    %cst_80 = arith.constant -1.000000e+09 : f32
    %186 = vector.broadcast %cst_80 : f32 to vector<8x8xf32>
    %187 = arith.select %7, %186, %185 : vector<8x8xi1>, vector<8x8xf32>
    %cst_81 = arith.constant dense<0xFF800000> : vector<8xf32>
    %188 = vector.multi_reduction <maximumf>, %187, %cst_81 [1] : vector<8x8xf32> to vector<8xf32>
    %189 = vector.shape_cast %188 : vector<8xf32> to vector<8x1xf32>
    %190 = vector.broadcast %189 : vector<8x1xf32> to vector<8x8xf32>
    %191 = arith.subf %187, %190 : vector<8x8xf32>
    %192 = math.exp %191 : vector<8x8xf32>
    %cst_82 = arith.constant dense<0.000000e+00> : vector<8xf32>
    %193 = vector.multi_reduction <add>, %192, %cst_82 [1] : vector<8x8xf32> to vector<8xf32>
    %194 = vector.shape_cast %193 : vector<8xf32> to vector<8x1xf32>
    %195 = tpu.reciprocal %194 {approx = true} : vector<8x1xf32> -> vector<8x1xf32>
    %196 = vector.broadcast %195 : vector<8x1xf32> to vector<8x8xf32>
    %197 = arith.mulf %192, %196 : vector<8x8xf32>
    %cst_83 = arith.constant dense<0.000000e+00> : vector<8x32xf32>
    %198 = tpu.matmul %197, %184, %cst_83 {dimension_numbers = #tpu.dot_dimension_numbers<[1], [0], [0], [1], [0, 0, 1, 1], [], []>} : vector<8x8xf32>, vector<8x32xf32>, vector<8x32xf32> -> vector<8x32xf32>
    %c96_84 = arith.constant 96 : index
    %c0_85 = arith.constant 0 : index
    %199 = vector.load %arg4[%c96_84, %c0_85] : memref<128x32xf32, #tpu.memory_space<vmem>>, vector<32x32xf32>
    %cst_86 = arith.constant dense<0.000000e+00> : vector<8x32xf32>
    %200 = tpu.matmul %198, %199, %cst_86 {dimension_numbers = #tpu.dot_dimension_numbers<[1], [0], [0], [1], [0, 0, 1, 1], [], []>} : vector<8x32xf32>, vector<32x32xf32>, vector<8x32xf32> -> vector<8x32xf32>
    %201 = arith.addf %177, %200 : vector<8x32xf32>
    %202 = tpu.concatenate %104, %201 in 0 : vector<8x32xf32>, vector<8x32xf32> -> vector<16x32xf32>
    %c0_87 = arith.constant 0 : index
    %c0_88 = arith.constant 0 : index
    %203 = vector.load %arg5[%c0_87, %c0_88] : memref<1x32xf32, #tpu.memory_space<vmem>>, vector<1x32xf32>
    %204 = vector.shape_cast %203 : vector<1x32xf32> to vector<32xf32>
    %205 = vector.shape_cast %204 : vector<32xf32> to vector<1x32xf32>
    %206 = vector.broadcast %205 : vector<1x32xf32> to vector<16x32xf32>
    %207 = arith.addf %202, %206 : vector<16x32xf32>
    %208 = arith.addf %207, %1 : vector<16x32xf32>
    %c0_89 = arith.constant 0 : index
    %c0_90 = arith.constant 0 : index
    %209 = vector.load %arg6[%c0_89, %c0_90] : memref<1x32xf32, #tpu.memory_space<vmem>>, vector<1x32xf32>
    %210 = vector.shape_cast %209 : vector<1x32xf32> to vector<32xf32>
    %c0_91 = arith.constant 0 : index
    %c0_92 = arith.constant 0 : index
    %211 = vector.load %arg7[%c0_91, %c0_92] : memref<1x32xf32, #tpu.memory_space<vmem>>, vector<1x32xf32>
    %212 = vector.shape_cast %211 : vector<1x32xf32> to vector<32xf32>
    %cst_93 = arith.constant dense<0.000000e+00> : vector<16xf32>
    %213 = vector.multi_reduction <add>, %208, %cst_93 [1] : vector<16x32xf32> to vector<16xf32>
    %214 = vector.shape_cast %213 : vector<16xf32> to vector<16x1xf32>
    %cst_94 = arith.constant 3.200000e+01 : f32
    %215 = vector.broadcast %cst_94 : f32 to vector<16x1xf32>
    %216 = arith.divf %214, %215 : vector<16x1xf32>
    %217 = vector.broadcast %216 : vector<16x1xf32> to vector<16x32xf32>
    %218 = arith.subf %208, %217 : vector<16x32xf32>
    %219 = arith.mulf %218, %218 : vector<16x32xf32>
    %cst_95 = arith.constant dense<0.000000e+00> : vector<16xf32>
    %220 = vector.multi_reduction <add>, %219, %cst_95 [1] : vector<16x32xf32> to vector<16xf32>
    %221 = vector.shape_cast %220 : vector<16xf32> to vector<16x1xf32>
    %cst_96 = arith.constant 3.200000e+01 : f32
    %222 = vector.broadcast %cst_96 : f32 to vector<16x1xf32>
    %223 = arith.divf %221, %222 : vector<16x1xf32>
    %224 = vector.broadcast %216 : vector<16x1xf32> to vector<16x32xf32>
    %225 = arith.subf %208, %224 : vector<16x32xf32>
    %cst_97 = arith.constant 9.99999974E-6 : f32
    %226 = vector.broadcast %cst_97 : f32 to vector<16x1xf32>
    %227 = arith.addf %223, %226 : vector<16x1xf32>
    %228 = math.rsqrt %227 : vector<16x1xf32>
    %229 = vector.broadcast %228 : vector<16x1xf32> to vector<16x32xf32>
    %230 = arith.mulf %225, %229 : vector<16x32xf32>
    %231 = vector.shape_cast %210 : vector<32xf32> to vector<1x32xf32>
    %232 = vector.broadcast %231 : vector<1x32xf32> to vector<16x32xf32>
    %233 = arith.mulf %230, %232 : vector<16x32xf32>
    %234 = vector.shape_cast %212 : vector<32xf32> to vector<1x32xf32>
    %235 = vector.broadcast %234 : vector<1x32xf32> to vector<16x32xf32>
    %236 = arith.addf %233, %235 : vector<16x32xf32>
    %c0_98 = arith.constant 0 : index
    %c0_99 = arith.constant 0 : index
    %237 = vector.load %arg8[%c0_98, %c0_99] : memref<32x128xf32, #tpu.memory_space<vmem>>, vector<32x128xf32>
    %cst_100 = arith.constant dense<0.000000e+00> : vector<16x128xf32>
    %238 = tpu.matmul %236, %237, %cst_100 {dimension_numbers = #tpu.dot_dimension_numbers<[1], [0], [0], [1], [0, 0, 1, 1], [], []>} : vector<16x32xf32>, vector<32x128xf32>, vector<16x128xf32> -> vector<16x128xf32>
    %c0_101 = arith.constant 0 : index
    %c0_102 = arith.constant 0 : index
    %239 = vector.load %arg9[%c0_101, %c0_102] : memref<1x128xf32, #tpu.memory_space<vmem>>, vector<1x128xf32>
    %240 = vector.shape_cast %239 : vector<1x128xf32> to vector<128xf32>
    %241 = vector.shape_cast %240 : vector<128xf32> to vector<1x128xf32>
    %242 = vector.broadcast %241 : vector<1x128xf32> to vector<16x128xf32>
    %243 = arith.addf %238, %242 : vector<16x128xf32>
    %cst_103 = arith.constant 0.000000e+00 : f32
    %244 = vector.broadcast %cst_103 : f32 to vector<16x128xf32>
    %245 = arith.maximumf %243, %244 : vector<16x128xf32>
    %c0_104 = arith.constant 0 : index
    %c0_105 = arith.constant 0 : index
    %246 = vector.load %arg10[%c0_104, %c0_105] : memref<128x32xf32, #tpu.memory_space<vmem>>, vector<128x32xf32>
    %cst_106 = arith.constant dense<0.000000e+00> : vector<16x32xf32>
    %247 = tpu.matmul %245, %246, %cst_106 {dimension_numbers = #tpu.dot_dimension_numbers<[1], [0], [0], [1], [0, 0, 1, 1], [], []>} : vector<16x128xf32>, vector<128x32xf32>, vector<16x32xf32> -> vector<16x32xf32>
    %c0_107 = arith.constant 0 : index
    %c0_108 = arith.constant 0 : index
    %248 = vector.load %arg11[%c0_107, %c0_108] : memref<1x32xf32, #tpu.memory_space<vmem>>, vector<1x32xf32>
    %249 = vector.shape_cast %248 : vector<1x32xf32> to vector<32xf32>
    %250 = vector.shape_cast %249 : vector<32xf32> to vector<1x32xf32>
    %251 = vector.broadcast %250 : vector<1x32xf32> to vector<16x32xf32>
    %252 = arith.addf %247, %251 : vector<16x32xf32>
    %253 = arith.addf %252, %236 : vector<16x32xf32>
    %c0_109 = arith.constant 0 : index
    %c0_110 = arith.constant 0 : index
    %254 = vector.load %arg12[%c0_109, %c0_110] : memref<1x32xf32, #tpu.memory_space<vmem>>, vector<1x32xf32>
    %255 = vector.shape_cast %254 : vector<1x32xf32> to vector<32xf32>
    %c0_111 = arith.constant 0 : index
    %c0_112 = arith.constant 0 : index
    %256 = vector.load %arg13[%c0_111, %c0_112] : memref<1x32xf32, #tpu.memory_space<vmem>>, vector<1x32xf32>
    %257 = vector.shape_cast %256 : vector<1x32xf32> to vector<32xf32>
    %cst_113 = arith.constant dense<0.000000e+00> : vector<16xf32>
    %258 = vector.multi_reduction <add>, %253, %cst_113 [1] : vector<16x32xf32> to vector<16xf32>
    %259 = vector.shape_cast %258 : vector<16xf32> to vector<16x1xf32>
    %cst_114 = arith.constant 3.200000e+01 : f32
    %260 = vector.broadcast %cst_114 : f32 to vector<16x1xf32>
    %261 = arith.divf %259, %260 : vector<16x1xf32>
    %262 = vector.broadcast %261 : vector<16x1xf32> to vector<16x32xf32>
    %263 = arith.subf %253, %262 : vector<16x32xf32>
    %264 = arith.mulf %263, %263 : vector<16x32xf32>
    %cst_115 = arith.constant dense<0.000000e+00> : vector<16xf32>
    %265 = vector.multi_reduction <add>, %264, %cst_115 [1] : vector<16x32xf32> to vector<16xf32>
    %266 = vector.shape_cast %265 : vector<16xf32> to vector<16x1xf32>
    %cst_116 = arith.constant 3.200000e+01 : f32
    %267 = vector.broadcast %cst_116 : f32 to vector<16x1xf32>
    %268 = arith.divf %266, %267 : vector<16x1xf32>
    %269 = vector.broadcast %261 : vector<16x1xf32> to vector<16x32xf32>
    %270 = arith.subf %253, %269 : vector<16x32xf32>
    %cst_117 = arith.constant 9.99999974E-6 : f32
    %271 = vector.broadcast %cst_117 : f32 to vector<16x1xf32>
    %272 = arith.addf %268, %271 : vector<16x1xf32>
    %273 = math.rsqrt %272 : vector<16x1xf32>
    %274 = vector.broadcast %273 : vector<16x1xf32> to vector<16x32xf32>
    %275 = arith.mulf %270, %274 : vector<16x32xf32>
    %276 = vector.shape_cast %255 : vector<32xf32> to vector<1x32xf32>
    %277 = vector.broadcast %276 : vector<1x32xf32> to vector<16x32xf32>
    %278 = arith.mulf %275, %277 : vector<16x32xf32>
    %279 = vector.shape_cast %257 : vector<32xf32> to vector<1x32xf32>
    %280 = vector.broadcast %279 : vector<1x32xf32> to vector<16x32xf32>
    %281 = arith.addf %278, %280 : vector<16x32xf32>
    %282 = vector.shape_cast %281 : vector<16x32xf32> to vector<2x8x32xf32>
    %c0_118 = arith.constant 0 : index
    %c0_119 = arith.constant 0 : index
    %c0_120 = arith.constant 0 : index
    %283 = vector.load %arg14[%c0_118, %c0_119, %c0_120] : memref<2x8x32xf32, #tpu.memory_space<vmem>>, vector<2x8x32xf32>
    tpu.vector_store %arg14[%c0_118, %c0_119, %c0_120], %282 {strides = array<i32>} : memref<2x8x32xf32, #tpu.memory_space<vmem>>, vector<2x8x32xf32>,
    return
  }
  func.func @transform_0(%arg0: i32) -> (i32, i32, i32) {
    %c0_i32 = arith.constant 0 : i32
    %c0_i32_0 = arith.constant 0 : i32
    %c0_i32_1 = arith.constant 0 : i32
    return %arg0, %c0_i32, %c0_i32_0 : i32, i32, i32
  }
  func.func @transform_1(%arg0: i32) -> (i32, i32, i32) {
    %c0_i32 = arith.constant 0 : i32
    %c0_i32_0 = arith.constant 0 : i32
    %c0_i32_1 = arith.constant 0 : i32
    %c0_i32_2 = arith.constant 0 : i32
    return %c0_i32, %c0_i32_0, %c0_i32_1 : i32, i32, i32
  }
  func.func @transform_2(%arg0: i32) -> (i32, i32) {
    %c0_i32 = arith.constant 0 : i32
    %c0_i32_0 = arith.constant 0 : i32
    %c0_i32_1 = arith.constant 0 : i32
    return %c0_i32, %c0_i32_0 : i32, i32
  }
  func.func @transform_3(%arg0: i32) -> (i32, i32) {
    %c0_i32 = arith.constant 0 : i32
    %c0_i32_0 = arith.constant 0 : i32
    %c0_i32_1 = arith.constant 0 : i32
    return %c0_i32, %c0_i32_0 : i32, i32
  }
  func.func @transform_4(%arg0: i32) -> (i32, i32) {
    %c0_i32 = arith.constant 0 : i32
    %c0_i32_0 = arith.constant 0 : i32
    %c0_i32_1 = arith.constant 0 : i32
    return %c0_i32, %c0_i32_0 : i32, i32
  }
  func.func @transform_5(%arg0: i32) -> (i32, i32) {
    %c0_i32 = arith.constant 0 : i32
    %c0_i32_0 = arith.constant 0 : i32
    %c0_i32_1 = arith.constant 0 : i32
    return %c0_i32, %c0_i32_0 : i32, i32
  }
  func.func @transform_6(%arg0: i32) -> (i32, i32) {
    %c0_i32 = arith.constant 0 : i32
    %c0_i32_0 = arith.constant 0 : i32
    %c0_i32_1 = arith.constant 0 : i32
    return %c0_i32, %c0_i32_0 : i32, i32
  }
  func.func @transform_7(%arg0: i32) -> (i32, i32) {
    %c0_i32 = arith.constant 0 : i32
    %c0_i32_0 = arith.constant 0 : i32
    %c0_i32_1 = arith.constant 0 : i32
    return %c0_i32, %c0_i32_0 : i32, i32
  }
  func.func @transform_8(%arg0: i32) -> (i32, i32) {
    %c0_i32 = arith.constant 0 : i32
    %c0_i32_0 = arith.constant 0 : i32
    %c0_i32_1 = arith.constant 0 : i32
    return %c0_i32, %c0_i32_0 : i32, i32
  }
  func.func @transform_9(%arg0: i32) -> (i32, i32) {
    %c0_i32 = arith.constant 0 : i32
    %c0_i32_0 = arith.constant 0 : i32
    %c0_i32_1 = arith.constant 0 : i32
    return %c0_i32, %c0_i32_0 : i32, i32
  }
  func.func @transform_10(%arg0: i32) -> (i32, i32) {
    %c0_i32 = arith.constant 0 : i32
    %c0_i32_0 = arith.constant 0 : i32
    %c0_i32_1 = arith.constant 0 : i32
    return %c0_i32, %c0_i32_0 : i32, i32
  }
  func.func @transform_11(%arg0: i32) -> (i32, i32) {
    %c0_i32 = arith.constant 0 : i32
    %c0_i32_0 = arith.constant 0 : i32
    %c0_i32_1 = arith.constant 0 : i32
    return %c0_i32, %c0_i32_0 : i32, i32
  }
  func.func @transform_12(%arg0: i32) -> (i32, i32) {
    %c0_i32 = arith.constant 0 : i32
    %c0_i32_0 = arith.constant 0 : i32
    %c0_i32_1 = arith.constant 0 : i32
    return %c0_i32, %c0_i32_0 : i32, i32
  }
  func.func @transform_13(%arg0: i32) -> (i32, i32, i32) {
    %c0_i32 = arith.constant 0 : i32
    %c0_i32_0 = arith.constant 0 : i32
    %c0_i32_1 = arith.constant 0 : i32
    return %arg0, %c0_i32, %c0_i32_0 : i32, i32, i32
  }
}

</mosaic_0001>

<bundles_post_ra>
// kernel: tpu_custom_call.1
= control target key start
LH: loop header
LB: loop body
LE: loop exit
PB: predicated region body
PF: predicated region fallthrough
CT: control target
= control target key end

     0   :  { %v3010_v7 = vmov 0.0   ;;  %s3542_s0 = inlined_call_operand.vmem [shape: f32[2,8,32], index: 0, kind: input, shape index: {}]   ;;  %s3543_s1 = inlined_call_operand.vmem [shape: f32[1,8,8], index: 1, kind: input, shape index: {}]   ;;  %s3544_s2 = inlined_call_operand.vmem [shape: f32[32,384], index: 2, kind: input, shape index: {}]   ;;  %s3545_s3 = inlined_call_operand.vmem [shape: f32[128,32], index: 3, kind: input, shape index: {}]   ;;  %s3546_s4 = inlined_call_operand.vmem [shape: f32[1,32], index: 4, kind: input, shape index: {}]   ;;  %s3547_s5 = inlined_call_operand.vmem [shape: f32[1,32], index: 5, kind: input, shape index: {}]   ;;  %s3548_s6 = inlined_call_operand.vmem [shape: f32[1,32], index: 6, kind: input, shape index: {}]   ;;  %s3549_s7 = inlined_call_operand.vmem [shape: f32[32,128], index: 7, kind: input, shape index: {}]   ;;  %s3550_s8 = inlined_call_operand.vmem [shape: f32[1,128], index: 8, kind: input, shape index: {}]   ;;  %s3551_s9 = inlined_call_operand.vmem [shape: f32[128,32], index: 9, kind: input, shape index: {}]   ;;  %s3552_s10 = inlined_call_operand.vmem [shape: f32[1,32], index: 10, kind: input, shape index: {}]   ;;  %s3553_s11 = inlined_call_operand.vmem [shape: f32[1,32], index: 11, kind: input, shape index: {}]   ;;  %s3554_s12 = inlined_call_operand.vmem [shape: f32[1,32], index: 12, kind: input, shape index: {}]   ;;  %s3555_s13 = inlined_call_operand.hbm [shape: f32[2,8,32], index: 13, kind: output, shape index: {}]  }
   0x1   :  { %v49_v0 = vld [vmem:[%s3544_s2 + $0x8] sm:$0xff]  ;;  %v52_v1 = vld [vmem:[%s3544_s2 + $0x20] sm:$0xff]  ;;  %v51_v4 = vld [vmem:[%s3544_s2 + $0x18] sm:$0xff]  ;;  %131 = vmatprep.mubr.f32.mxu0 %v3010_v7  ;;  %2619 = vmatprep.subr.mxu1 %v3010_v7 }
   0x2   :  { %v48_v2 = vld [vmem:[%s3544_s2] sm:$0xff]  ;;  %v2833_v3 = vpack.c.bf16 %v52_v1, %v49_v0  ;;  %v55_v5 = vld [vmem:[%s3544_s2 + $0x38] sm:$0xff]  ;;  %v58_v6 = vld [vmem:[%s3544_s2 + $0x50] sm:$0xff] }
   0x3   :  { %v2835_v8 = vpack.c.bf16 %v51_v4, %v48_v2  ;;  %v2837_v9 = vpack.c.bf16 %v58_v6, %v55_v5  ;;  %v54_v10 = vld [vmem:[%s3544_s2 + $0x30] sm:$0xff]  ;;  %v57_v11 = vld [vmem:[%s3544_s2 + $0x48] sm:$0xff] }
   0x4   :  { %2834 = vmatprep.subr.bf16.mxu0 %v2833_v3 }
   0x5   :  { %18 = vsyncpa [#allocation3], 0  ;;  %2836 = vmatpush1.bf16.msra.mxu0 %v2835_v8  ;;  %v2839_v12 = vpack.c.bf16 %v57_v11, %v54_v10  ;;  %v3118_v13 = vld [vmem:[%s3542_s0] sm:$0xff]  ;;  %vm60_vm0 = vcmask 261120   ;;  %vm3011_vm1 = vmmov 0   ;;  %v50_v15 = vld [vmem:[%s3544_s2 + $0x10] sm:$0xff] }
   0x6   :  { %2838 = vmatprep.subr.bf16.mxu0 %v2837_v9  ;;  %2621 = vmatprep.mubr.msk.f32.mxu1 %vm3011_vm1, %v3010_v7  ;;  %v53_v16 = vld [vmem:[%s3544_s2 + $0x28] sm:$0xff]  ;;  %v56_v20 = vld [vmem:[%s3544_s2 + $0x40] sm:$0xff]  ;;  %v59_v21 = vld [vmem:[%s3544_s2 + $0x58] sm:$0xff]  ;;  %s3013_s19 = smov 96   ;;  %vm299_vm3 = vcmask 64512   ;;  %v3015_v8 = vmov 0.0|0.0  }
   0x7   :  { %v3134_v17 = vld [vmem:[%s3542_s0 + $0x8] sm:$0xff]  ;;  %v2841_v19 = vpack.c.bf16 %v53_v16, %v50_v15  ;;  %v2845_v23 = vpack.c.bf16 %v59_v21, %v56_v20  ;;  %s3012_s0 = smov 64   ;;  %v3176_v31 = vld [vmem:[%s3543_s1] sm:$0xff]  ;;  %s3014_s1 = smov 32   ;;  %v557_v6 = vld [vmem:[%s3545_s3 + $0x30] sm:$0xff] }
   0x8   :  { %vm219_vm2 = vcmp.eq.f32.partialorder %v3176_v31, 0.0  ;;  %v555_v4 = vld [vmem:[%s3545_s3 + $0x20] sm:$0xff]  ;;  %v556_v5 = vld [vmem:[%s3545_s3 + $0x28] sm:$0xff]  ;;  %v558_v10 = vld [vmem:[%s3545_s3 + $0x38] sm:$0xff] }
   0x9   :  { %2840 = vmatpush1.bf16.msra.mxu0 %v2839_v12  ;;  %v3219_v9 = vpack.c.bf16 %v556_v5, %v555_v4  ;;  %v3226_v11 = vpack.c.bf16 %v558_v10, %v557_v6  ;;  %v384_v16 = vld [vmem:[%s3545_s3] sm:$0xff]  ;;  %v386_v20 = vld [vmem:[%s3545_s3 + $0x10] sm:$0xff]  ;;  %v387_v21 = vld [vmem:[%s3545_s3 + $0x18] sm:$0xff] }
   0xa   :  { %2842 = vmatprep.subr.bf16.mxu0 %v2841_v19 }
   0xc   :  { %2461 = vmatmul.mubr.msk.f32.vlgmr.msra.gmra.mrb[0].mxu0 %vm60_vm0, %v3118_v13 }
   0xd   :  { %137 = vmatprep.mubr.f32.mxu0 %v3010_v7  ;;  %2844 = vmatpush3.bf16.msra.mxu0 %v2841_v19 }
   0xe   :  { %2846 = vmatprep.subr.bf16.mxu0 %v2845_v23 }
  0x10   :  { %2462 = vmatmul.mubr.msk.f32.gmra.mrb[2].mxu0 %vm60_vm0, %v3134_v17 }
  0x11   :  { %2616 = vmatprep.mubr.msk.f32.mxu0 %vm60_vm0, %v3118_v13  ;;  %2848 = vmatpush3.bf16.msra.mxu0 %v2845_v23 }
  0x12   :  { %2624 = vmatprep.subr.mxu0 %v3010_v7 }
  0x14   :  { %2617 = vmatmul.mubr.msk.f32.vlgmr.msra.gmra.mrb[4].mxu0 %vm60_vm0, %v3134_v17 }
  0x15   :  { %2626 = vmatprep.mubr.msk.f32.mxu0 %vm3011_vm1, %v3010_v7 }
  0xdf   :  { %v133_v14 = vpop.f32.mrb[0].mxu0 }
  0xe0   :  { %v135_v18 = vpop.f32.mrb[1].mxu0  ;;  %v220_v24 = vmul.f32 0.4204482, %v133_v14 }
  0xe1   :  { %v221_v22 = vmul.f32 0.4204482, %v135_v18  ;;  %v385_v18 = vld [vmem:[%s3545_s3 + $0x8] sm:$0xff] }
  0xe2   :  { %v3237_v19 = vpack.c.bf16 %v385_v18, %v384_v16 }
  0xe3   :  { %707 = vrot.lane.b32.xlu1 %v221_v22, %s3012_s0  ;;  %390 = vrot.lane.b32.xlu0 %v221_v22, %s3013_s19  ;;  %v3169_v29 = vpop.f32.mrb[2].mxu0 }
  0xe4   :  { %2620 = vmatpush3.xpose.msk.msra.mxu1 %vm60_vm0, %v221_v22  ;;  %v3171_v30 = vpop.f32.mrb[3].mxu0 }
  0xe5   :  { %2629 = vmatprep.subr.mxu1 %v3010_v7 }
  0xe7   :  { %2622 = vmatmul.mubr.msk.f32.vlgmr.msra.gmra.mrb[0].mxu1 %vm60_vm0, %v220_v24  ;;  %705 = vrot.lane.b32.xlu1 %v220_v24, %s3012_s0  ;;  %v3182_v36 = vpop.f32.mrb[4].mxu0 }
  0xe8   :  { %388 = vrot.lane.b32.xlu0 %v220_v24, %s3013_s19  ;;  %2631 = vmatprep.mubr.msk.f32.mxu1 %vm3011_vm1, %v3010_v7  ;;  %v3184_v37 = vpop.f32.mrb[5].mxu0 }
  0xe9   :  { %2625 = vmatpush3.msra.mxu0 %v3184_v37 }
  0xea   :  { %2634 = vmatprep.subr.mxu0 %v3010_v7 }
 0x155   :  { %v391_v25 = vpop.permute.xlu0 %390  ;;  %v708_v26 = vpop.permute.xlu1 %707 }
 0x156   :  { %2630 = vmatpush3.xpose.msk.msra.mxu1 %vm60_vm0, %v391_v25 }
 0x157   :  { %2661 = vmatprep.subr.mxu1 %v3010_v7 }
 0x159   :  { %v706_v28 = vpop.permute.xlu1 %705 }
 0x15a   :  { %v389_v27 = vpop.permute.xlu0 %388 }
 0x15b   :  { %2632 = vmatmul.mubr.msk.f32.vlgmr.msra.gmra.mrb[2].mxu1 %vm60_vm0, %v389_v27 }
 0x15c   :  { %2662 = vmatpush3.xpose.msk.msra.mxu1 %vm60_vm0, %v708_v26  ;;  %2663 = vmatprep.mubr.msk.f32.mxu1 %vm3011_vm1, %v3010_v7 }
 0x15d   :  { %2861 = vmatprep.subr.bf16.mxu1 %v3015_v8 }
 0x15f   :  { %2664 = vmatmul.mubr.msk.f32.vlgmr.msra.gmra.mrb[4].mxu1 %vm60_vm0, %v706_v28 }
 0x160   :  { %2679 = vmatprep.mubr.msk.f32.mxu1 %vm3011_vm1, %v3010_v7 }
 0x1ba   :  { %v294_v32 = vpop.f32.mrb[0].mxu1 }
 0x1bb   :  { %v298_v33 = vsel %vm219_vm2, -1e+09, %v294_v32  ;;  %v2623_v34 = vpop.f32.mrb[1].mxu1 }
 0x1bc   :  { %v300_v35 = vsel %vm299_vm3, %v298_v33, -inf  ;;  %v872_v34 = vld [vmem:[%s3545_s3 + $0x48] sm:$0xff] }
 0x1bd   :  { %301 = vmax.xlane.f32.xlu0 %v300_v35 }
 0x22e   :  { %v462_v38 = vpop.f32.mrb[2].mxu1 }
 0x22f   :  { %v466_v39 = vsel %vm219_vm2, -1e+09, %v462_v38  ;;  %v2633_v40 = vpop.f32.mrb[3].mxu1  ;;  %v873_v38 = vld [vmem:[%s3545_s3 + $0x50] sm:$0xff] }
 0x230   :  { %v467_v41 = vsel %vm299_vm3, %v466_v39, -inf }
 0x231   :  { %468 = vmax.xlane.f32.xlu1 %v467_v41 }
 0x232   :  { %v779_v42 = vpop.f32.mrb[4].mxu1 }
 0x233   :  { %v2665_v43 = vpop.f32.mrb[5].mxu1  ;;  %v783_v54 = vsel %vm219_vm2, -1e+09, %v779_v42 }
 0x234   :  { %v784_v55 = vsel %vm299_vm3, %v783_v54, -inf }
 0x242   :  { %479 = vrot.lane.b32.xlu1 %v3184_v37, %s3013_s19 }
 0x246   :  { %951 = vrot.lane.b32.xlu1 %v221_v22, %s3014_s1 }
 0x24a   :  { %v302_v44 = vpop.xlane.xlu0 %301  ;;  %949 = vrot.lane.b32.xlu1 %v220_v24, %s3014_s1  ;;  %v3247_v24 = vpack.c.bf16 %v387_v21, %v386_v20 }
 0x24b   :  { %v303_v45 = vsub.f32 %v298_v33, %v302_v44  ;;  %v871_v33 = vld [vmem:[%s3545_s3 + $0x40] sm:$0xff] }
 0x24c   :  { %v3272_v35 = vpack.c.bf16 %v872_v34, %v871_v33 }
 0x24d   :  { %v304_v46 = vmul.f32 1.442695, %v303_v45 }
 0x24e   :  { %2863 = vmatpush3.bf16.msra.mxu1 %v3272_v35 }
 0x24f   :  { %2946 = vpow2.f32 %v304_v46  ;;  %2864 = vmatprep.subr.bf16.mxu1 %v3015_v8 }
 0x259   :  { %v2947_v47 = vpop.eup %2946 }
 0x25a   :  { %v306_v48 = vsel %vm299_vm3, %v2947_v47, 0.0 }
 0x25b   :  { %307 = vadd.xlane.f32.xlu0 %v306_v48 }
 0x2be   :  { %v469_v49 = vpop.xlane.xlu1 %468 }
 0x2bf   :  { %v470_v50 = vsub.f32 %v466_v39, %v469_v49  ;;  %v874_v39 = vld [vmem:[%s3545_s3 + $0x58] sm:$0xff] }
 0x2c0   :  { %v3282_v40 = vpack.c.bf16 %v874_v39, %v873_v38 }
 0x2c1   :  { %v471_v51 = vmul.f32 1.442695, %v470_v50 }
 0x2c2   :  { %v480_v59 = vpop.permute.xlu1 %479  ;;  %2866 = vmatpush3.bf16.msra.mxu1 %v3282_v40 }
 0x2c3   :  { %2948 = vpow2.f32 %v471_v51  ;;  %2867 = vmatprep.subr.bf16.mxu1 %v3015_v8 }
 0x2c6   :  { %v952_v28 = vpop.permute.xlu1 %951 }
 0x2ca   :  { %v950_v32 = vpop.permute.xlu1 %949 }
 0x2cd   :  { %v2949_v52 = vpop.eup %2948 }
 0x2ce   :  { %v473_v53 = vsel %vm299_vm3, %v2949_v52, 0.0 }
 0x2cf   :  { %474 = vadd.xlane.f32.xlu0 %v473_v53 }
 0x2d3   :  { %785 = vmax.xlane.f32.xlu0 %v784_v55 }
 0x2e8   :  { %v308_v56 = vpop.xlane.xlu0 %307 }
 0x2e9   :  { %2950 = vrcp.f32 %v308_v56 }
 0x2f3   :  { %v2951_v57 = vpop.eup %2950 }
 0x2f4   :  { %v310_v58 = vmul.f32 %v2951_v57, %v2947_v47 }
 0x2f6   :  { %2627 = vmatmul.mubr.msk.f32.vlgmr.msra.gmra.mrb[6].mxu0 %vm299_vm3, %v310_v58 }
 0x2f7   :  { %2635 = vmatpush3.msra.mxu0 %v480_v59  ;;  %2636 = vmatprep.mubr.msk.f32.mxu0 %vm3011_vm1, %v3010_v7  ;;  %v1116_v59 = vld [vmem:[%s3545_s3 + $0x68] sm:$0xff] }
 0x2f8   :  { %2849 = vmatprep.subr.bf16.mxu0 %v3015_v8 }
 0x35c   :  { %v475_v60 = vpop.xlane.xlu0 %474 }
 0x35d   :  { %2952 = vrcp.f32 %v475_v60  ;;  %v1117_v60 = vld [vmem:[%s3545_s3 + $0x70] sm:$0xff] }
 0x360   :  { %v786_v61 = vpop.xlane.xlu0 %785 }
 0x361   :  { %v787_v62 = vsub.f32 %v783_v54, %v786_v61 }
 0x363   :  { %v788_v63 = vmul.f32 1.442695, %v787_v62 }
 0x365   :  { %2954 = vpow2.f32 %v788_v63 }
 0x367   :  { %v2953_v0 = vpop.eup %2952 }
 0x368   :  { %v477_v1 = vmul.f32 %v2953_v0, %v2949_v52  ;;  %v3295_v52 = vmul.f32 0.4204482, %v3169_v29  ;;  %v1115_v29 = vld [vmem:[%s3545_s3 + $0x60] sm:$0xff] }
 0x369   :  { %v3315_v61 = vpack.c.bf16 %v1116_v59, %v1115_v29 }
 0x36a   :  { %2637 = vmatmul.mubr.msk.f32.vlgmr.msra.gmra.mrb[8].mxu0 %vm299_vm3, %v477_v1 }
 0x36b   :  { %2647 = vmatprep.mubr.msk.f32.mxu0 %vm3011_vm1, %v3010_v7  ;;  %2851 = vmatpush3.bf16.msra.mxu0 %v3219_v9 }
 0x36c   :  { %2852 = vmatprep.subr.bf16.mxu0 %v3015_v8 }
 0x36f   :  { %v2955_v2 = vpop.eup %2954  ;;  %2854 = vmatpush3.bf16.msra.mxu0 %v3226_v11 }
 0x370   :  { %v790_v3 = vsel %vm299_vm3, %v2955_v2, 0.0  ;;  %2855 = vmatprep.subr.bf16.mxu0 %v3015_v8 }
 0x371   :  { %791 = vadd.xlane.f32.xlu0 %v790_v3 }
 0x387   :  { %795 = vrot.lane.b32.xlu0 %v3184_v37, %s3012_s0 }
 0x3c9   :  { %v380_v12 = vpop.f32.mrb[6].mxu0 }
 0x3ca   :  { %v2628_v14 = vpop.f32.mrb[7].mxu0 }
 0x3fe   :  { %v792_v15 = vpop.xlane.xlu0 %791 }
 0x3ff   :  { %2956 = vrcp.f32 %v792_v15 }
 0x402   :  { %v796_v26 = vpop.permute.xlu0 %795 }
 0x409   :  { %v2957_v25 = vpop.eup %2956 }
 0x40a   :  { %v794_v27 = vmul.f32 %v2957_v25, %v2955_v2 }
 0x43d   :  { %v551_v22 = vpop.f32.mrb[8].mxu0 }
 0x43e   :  { %v2638_v23 = vpop.f32.mrb[9].mxu0  ;;  %2648 = vmatmul.mubr.msk.f32.vlgmr.msra.gmra.mrb[10].mxu0 %vm60_vm0, %v551_v22 }
 0x43f   :  { %2857 = vmatpush3.bf16.msra.mxu0 %v3237_v19  ;;  %2658 = vmatprep.mubr.msk.f32.mxu0 %vm3011_vm1, %v3010_v7 }
 0x440   :  { %2858 = vmatprep.subr.bf16.mxu0 %v3015_v8 }
 0x443   :  { %2860 = vmatpush3.bf16.msra.mxu0 %v3247_v24 }
 0x444   :  { %2666 = vmatprep.subr.mxu0 %v3010_v7 }
 0x446   :  { %2659 = vmatmul.mubr.msk.f32.vlgmr.msra.gmra.mrb[12].mxu0 %vm60_vm0, %v380_v12 }
 0x447   :  { %2667 = vmatpush3.msra.mxu0 %v796_v26  ;;  %2668 = vmatprep.mubr.msk.f32.mxu0 %vm3011_vm1, %v3010_v7 }
 0x448   :  { %2682 = vmatprep.subr.mxu0 %v3010_v7 }
 0x44a   :  { %2669 = vmatmul.mubr.msk.f32.vlgmr.msra.gmra.mrb[14].mxu0 %vm299_vm3, %v794_v27 }
 0x44b   :  { %2684 = vmatprep.mubr.msk.f32.mxu0 %vm3011_vm1, %v3010_v7 }
 0x44e   :  { %2683 = vmatpush3.xpose.msk.msra.mxu0 %vm60_vm0, %v952_v28 }
 0x44f   :  { %2687 = vmatprep.subr.mxu0 %v3010_v7 }
 0x451   :  { %2685 = vmatmul.mubr.msk.f32.vlgmr.msra.gmra.mrb[16].mxu0 %vm60_vm0, %v950_v32 }
 0x452   :  { %2689 = vmatprep.mubr.msk.f32.mxu0 %vm3011_vm1, %v3010_v7 }
 0x511   :  { %v628_v41 = vpop.f32.mrb[10].mxu0 }
 0x512   :  { %v2649_v42 = vpop.f32.mrb[11].mxu0 }
 0x519   :  { %v701_v43 = vpop.f32.mrb[12].mxu0 }
 0x51a   :  { %v702_v44 = vadd.f32 %v701_v43, %v628_v41  ;;  %v2660_v45 = vpop.f32.mrb[13].mxu0 }
 0x51d   :  { %v867_v46 = vpop.f32.mrb[14].mxu0 }
 0x51e   :  { %v2670_v47 = vpop.f32.mrb[15].mxu0  ;;  %2680 = vmatmul.mubr.msk.f32.vlgmr.msra.gmra.mrb[6].mxu1 %vm60_vm0, %v867_v46 }
 0x51f   :  { %2700 = vmatprep.mubr.msk.f32.mxu1 %vm3011_vm1, %v3010_v7  ;;  %2869 = vmatpush3.bf16.msra.mxu1 %v3315_v61 }
 0x520   :  { %2870 = vmatprep.subr.bf16.mxu1 %v3015_v8 }
 0x524   :  { %v1023_v48 = vpop.f32.mrb[16].mxu0 }
 0x525   :  { %v1027_v49 = vsel %vm219_vm2, -1e+09, %v1023_v48  ;;  %v2686_v50 = vpop.f32.mrb[17].mxu0 }
 0x526   :  { %v1028_v51 = vsel %vm299_vm3, %v1027_v49, -inf }
 0x527   :  { %1029 = vmax.xlane.f32.xlu1 %v1028_v51 }
 0x538   :  { %1039 = vrot.lane.b32.xlu1 %v3184_v37, %s3014_s1  ;;  %v3302_v37 = vmul.f32 0.4204482, %v3171_v30  ;;  %v1118_v30 = vld [vmem:[%s3545_s3 + $0x78] sm:$0xff] }
 0x539   :  { %v3321_v62 = vpack.c.bf16 %v1118_v30, %v1117_v60 }
 0x53b   :  { %2872 = vmatpush3.bf16.msra.mxu1 %v3321_v62 }
 0x53c   :  { %1356 = vrot.lane.b32.xlu1 %v3295_v52, %s3013_s19  ;;  %2713 = vmatprep.subr.mxu1 %v3010_v7 }
 0x5b4   :  { %v1030_v53 = vpop.xlane.xlu1 %1029 }
 0x5b5   :  { %v1031_v54 = vsub.f32 %v1027_v49, %v1030_v53 }
 0x5b7   :  { %v1032_v55 = vmul.f32 1.442695, %v1031_v54 }
 0x5b8   :  { %v1040_v56 = vpop.permute.xlu1 %1039 }
 0x5b9   :  { %2958 = vpow2.f32 %v1032_v55  ;;  %2688 = vmatpush3.msra.mxu0 %v1040_v56 }
 0x5ba   :  { %2703 = vmatprep.subr.mxu0 %v3010_v7 }
 0x5bc   :  { %v1357_v12 = vpop.permute.xlu1 %1356 }
 0x5c3   :  { %v2959_v57 = vpop.eup %2958 }
 0x5c4   :  { %v1034_v58 = vsel %vm299_vm3, %v2959_v57, 0.0 }
 0x5c5   :  { %1035 = vadd.xlane.f32.xlu0 %v1034_v58 }
 0x5db   :  { %1358 = vrot.lane.b32.xlu0 %v3302_v37, %s3013_s19 }
 0x5f1   :  { %v944_v63 = vpop.f32.mrb[6].mxu1 }
 0x5f2   :  { %v948_v0 = vadd.f32 %v944_v63, %v702_v44  ;;  %v2681_v1 = vpop.f32.mrb[7].mxu1 }
 0x652   :  { %v1036_v2 = vpop.xlane.xlu0 %1035 }
 0x653   :  { %2960 = vrcp.f32 %v1036_v2 }
 0x656   :  { %v1359_v6 = vpop.permute.xlu0 %1358 }
 0x65d   :  { %v2961_v3 = vpop.eup %2960 }
 0x65e   :  { %v1038_v4 = vmul.f32 %v2961_v3, %v2959_v57 }
 0x660   :  { %2690 = vmatmul.mubr.msk.f32.vlgmr.msra.gmra.mrb[18].mxu0 %vm299_vm3, %v1038_v4 }
 0x661   :  { %2704 = vmatpush3.xpose.msk.msra.mxu0 %vm60_vm0, %v3302_v37  ;;  %2705 = vmatprep.mubr.msk.f32.mxu0 %vm3011_vm1, %v3010_v7 }
 0x662   :  { %2708 = vmatprep.subr.mxu0 %v3010_v7 }
 0x664   :  { %2706 = vmatmul.mubr.msk.f32.vlgmr.msra.gmra.mrb[20].mxu0 %vm60_vm0, %v3295_v52 }
 0x665   :  { %2709 = vmatpush3.msra.mxu0 %v3182_v36  ;;  %2710 = vmatprep.mubr.msk.f32.mxu0 %vm3011_vm1, %v3010_v7 }
 0x666   :  { %2718 = vmatprep.subr.mxu0 %v3010_v7 }
 0x733   :  { %v1111_v5 = vpop.f32.mrb[18].mxu0 }
 0x734   :  { %v2691_v10 = vpop.f32.mrb[19].mxu0  ;;  %2701 = vmatmul.mubr.msk.f32.vlgmr.msra.gmra.mrb[8].mxu1 %vm60_vm0, %v1111_v5 }
 0x735   :  { %2714 = vmatpush3.xpose.msk.msra.mxu1 %vm60_vm0, %v1359_v6  ;;  %2715 = vmatprep.mubr.msk.f32.mxu1 %vm3011_vm1, %v3010_v7 }
 0x736   :  { %2873 = vmatprep.subr.bf16.mxu1 %v3015_v8 }
 0x737   :  { %v1267_v14 = vpop.f32.mrb[20].mxu0 }
 0x738   :  { %v1271_v15 = vsel %vm219_vm2, -1e+09, %v1267_v14  ;;  %v2707_v16 = vpop.f32.mrb[21].mxu0  ;;  %2716 = vmatmul.mubr.msk.f32.vlgmr.msra.gmra.mrb[10].mxu1 %vm60_vm0, %v1357_v12 }
 0x739   :  { %v1272_v18 = vsel %vm299_vm3, %v1271_v15, -inf  ;;  %2875 = vmatpush3.bf16.msra.mxu1 %v3219_v9  ;;  %2731 = vmatprep.mubr.msk.f32.mxu1 %vm3011_vm1, %v3010_v7 }
 0x73a   :  { %1273 = vmax.xlane.f32.xlu1 %v1272_v18  ;;  %2876 = vmatprep.subr.bf16.mxu1 %v3015_v8 }
 0x73d   :  { %2878 = vmatpush3.bf16.msra.mxu1 %v3226_v11 }
 0x73e   :  { %2745 = vmatprep.subr.mxu1 %v3010_v7 }
 0x7c7   :  { %v1274_v20 = vpop.xlane.xlu1 %1273 }
 0x7c8   :  { %v1275_v21 = vsub.f32 %v1271_v15, %v1274_v20 }
 0x7ca   :  { %v1276_v22 = vmul.f32 1.442695, %v1275_v21 }
 0x7cc   :  { %2962 = vpow2.f32 %v1276_v22 }
 0x7d6   :  { %v2963_v33 = vpop.eup %2962 }
 0x7d7   :  { %v1278_v11 = vsel %vm299_vm3, %v2963_v33, 0.0 }
 0x807   :  { %v1188_v23 = vpop.f32.mrb[8].mxu1 }
 0x808   :  { %v3353_v25 = vadd.f32 %v1188_v23, %v948_v0  ;;  %v2702_v26 = vpop.f32.mrb[9].mxu1 }
 0x80b   :  { %v1430_v27 = vpop.f32.mrb[10].mxu1 }
 0x80c   :  { %v1434_v9 = vsel %vm219_vm2, -1e+09, %v1430_v27  ;;  %v2717_v28 = vpop.f32.mrb[11].mxu1 }
 0x80d   :  { %v1435_v32 = vsel %vm299_vm3, %v1434_v9, -inf }
 0x80e   :  { %1436 = vmax.xlane.f32.xlu0 %v1435_v32 }
 0x812   :  { %1279 = vadd.xlane.f32.xlu0 %v1278_v11 }
 0x828   :  { %1447 = vrot.lane.b32.xlu0 %v3182_v36, %s3013_s19 }
 0x89b   :  { %v1437_v34 = vpop.xlane.xlu0 %1436 }
 0x89c   :  { %v1438_v38 = vsub.f32 %v1434_v9, %v1437_v34 }
 0x89e   :  { %v1439_v39 = vmul.f32 1.442695, %v1438_v38 }
 0x89f   :  { %v1280_v41 = vpop.xlane.xlu0 %1279 }
 0x8a0   :  { %2964 = vpow2.f32 %v1439_v39 }
 0x8a1   :  { %2966 = vrcp.f32 %v1280_v41 }
 0x8a3   :  { %v1448_v46 = vpop.permute.xlu0 %1447 }
 0x8aa   :  { %v2965_v42 = vpop.eup %2964 }
 0x8ab   :  { %v2967_v43 = vpop.eup %2966  ;;  %v1441_v44 = vsel %vm299_vm3, %v2965_v42, 0.0 }
 0x8ac   :  { %v1282_v45 = vmul.f32 %v2967_v43, %v2963_v33  ;;  %1442 = vadd.xlane.f32.xlu1 %v1441_v44 }
 0x8ae   :  { %2711 = vmatmul.mubr.msk.f32.vlgmr.msra.gmra.mrb[22].mxu0 %vm299_vm3, %v1282_v45 }
 0x8af   :  { %2719 = vmatpush3.msra.mxu0 %v1448_v46  ;;  %2720 = vmatprep.mubr.msk.f32.mxu0 %vm3011_vm1, %v3010_v7 }
 0x8b0   :  { %2879 = vmatprep.subr.bf16.mxu0 %v3015_v8 }
 0x8bd   :  { %1671 = vrot.lane.b32.xlu1 %v3302_v37, %s3012_s0 }
 0x8c1   :  { %1669 = vrot.lane.b32.xlu1 %v3295_v52, %s3012_s0 }
 0x939   :  { %v1443_v47 = vpop.xlane.xlu1 %1442 }
 0x93a   :  { %2968 = vrcp.f32 %v1443_v47 }
 0x93d   :  { %v1672_v53 = vpop.permute.xlu1 %1671 }
 0x944   :  { %v2969_v48 = vpop.eup %2968 }
 0x945   :  { %v1445_v49 = vmul.f32 %v2969_v48, %v2965_v42 }
 0x947   :  { %2721 = vmatmul.mubr.msk.f32.vlgmr.msra.gmra.mrb[24].mxu0 %vm299_vm3, %v1445_v49 }
 0x948   :  { %2881 = vmatpush3.bf16.msra.mxu0 %v3237_v19  ;;  %2742 = vmatprep.mubr.msk.f32.mxu0 %vm3011_vm1, %v3010_v7  ;;  %v1670_v19 = vpop.permute.xlu1 %1669 }
 0x949   :  { %2882 = vmatprep.subr.bf16.mxu0 %v3015_v8 }
 0x94c   :  { %2884 = vmatpush3.bf16.msra.mxu0 %v3247_v24 }
 0x94d   :  { %2750 = vmatprep.subr.mxu0 %v3010_v7 }
 0x981   :  { %v1352_v50 = vpop.f32.mrb[22].mxu0 }
 0x982   :  { %v2712_v51 = vpop.f32.mrb[23].mxu0  ;;  %2743 = vmatmul.mubr.msk.f32.vlgmr.msra.gmra.mrb[26].mxu0 %vm60_vm0, %v1352_v50 }
 0x983   :  { %2752 = vmatprep.mubr.msk.f32.mxu0 %vm3011_vm1, %v3010_v7 }
 0xa1a   :  { %v1519_v54 = vpop.f32.mrb[24].mxu0 }
 0xa1b   :  { %v2722_v55 = vpop.f32.mrb[25].mxu0  ;;  %2732 = vmatmul.mubr.msk.f32.vlgmr.msra.gmra.mrb[12].mxu1 %vm60_vm0, %v1519_v54 }
 0xa1c   :  { %2746 = vmatpush3.xpose.msk.msra.mxu1 %vm60_vm0, %v1672_v53  ;;  %2747 = vmatprep.mubr.msk.f32.mxu1 %vm3011_vm1, %v3010_v7 }
 0xa1d   :  { %2885 = vmatprep.subr.bf16.mxu1 %v3015_v8 }
 0xa1f   :  { %2748 = vmatmul.mubr.msk.f32.vlgmr.msra.gmra.mrb[14].mxu1 %vm60_vm0, %v1670_v19 }
 0xa20   :  { %2887 = vmatpush3.bf16.msra.mxu1 %v3272_v35  ;;  %2763 = vmatprep.mubr.msk.f32.mxu1 %vm3011_vm1, %v3010_v7 }
 0xa21   :  { %2888 = vmatprep.subr.bf16.mxu1 %v3015_v8 }
 0xa24   :  { %2890 = vmatpush3.bf16.msra.mxu1 %v3282_v40 }
 0xa25   :  { %2891 = vmatprep.subr.bf16.mxu1 %v3015_v8 }
 0xa55   :  { %v1665_v24 = vpop.f32.mrb[26].mxu0 }
 0xa56   :  { %v2744_v56 = vpop.f32.mrb[27].mxu0 }
 0xaee   :  { %v1592_v57 = vpop.f32.mrb[12].mxu1 }
 0xaef   :  { %v1666_v58 = vadd.f32 %v1665_v24, %v1592_v57  ;;  %v2733_v29 = vpop.f32.mrb[13].mxu1  ;;  %v2498_v24 = vld [vmem:[%s3547_s5] ss:$0 sm:$0xff] }
 0xaf0   :  { %v2499_v57 = vld [vmem:[%s3548_s6] ss:$0 sm:$0xff] }
 0xaf2   :  { %v1743_v59 = vpop.f32.mrb[14].mxu1 }
 0xaf3   :  { %v1747_v60 = vsel %vm219_vm2, -1e+09, %v1743_v59  ;;  %v2749_v30 = vpop.f32.mrb[15].mxu1  ;;  %v2205_v59 = vld [vmem:[%s3549_s7] sm:$0xff] }
 0xaf4   :  { %v1748_v35 = vsel %vm299_vm3, %v1747_v60, -inf }
 0xaf5   :  { %1749 = vmax.xlane.f32.xlu0 %v1748_v35  ;;  %v2207_v35 = vld [vmem:[%s3549_s7 + $0x10] sm:$0xff] }
 0xb0b   :  { %1759 = vrot.lane.b32.xlu0 %v3182_v36, %s3012_s0  ;;  %s3016_s0 = smov [#allocation2]  }
 0xb0f   :  { %1909 = vrot.lane.b32.xlu0 %v3295_v52, %s3014_s1 }
 0xb82   :  { %v1750_v40 = vpop.xlane.xlu0 %1749 }
 0xb83   :  { %v1751_v63 = vsub.f32 %v1747_v60, %v1750_v40  ;;  %v2206_v60 = vld [vmem:[%s3549_s7 + $0x8] sm:$0xff]  ;;  %v2208_v40 = vld [vmem:[%s3549_s7 + $0x18] sm:$0xff] }
 0xb84   :  { %v2897_v30 = vpack.c.bf16 %v2206_v60, %v2205_v59 }
 0xb85   :  { %v1752_v0 = vmul.f32 1.442695, %v1751_v63  ;;  %v2901_v63 = vpack.c.bf16 %v2208_v40, %v2207_v35 }
 0xb86   :  { %v1760_v1 = vpop.permute.xlu0 %1759 }
 0xb87   :  { %2970 = vpow2.f32 %v1752_v0  ;;  %2751 = vmatpush3.msra.mxu0 %v1760_v1  ;;  %v2299_v0 = vld [vmem:[%s3551_s9] sm:$0xff]  ;;  %v2300_v1 = vld [vmem:[%s3551_s9 + $0x8] sm:$0xff] }
 0xb88   :  { %2766 = vmatprep.subr.mxu0 %v3010_v7 }
 0xb8a   :  { %v1910_v10 = vpop.permute.xlu0 %1909 }
 0xb91   :  { %v2971_v2 = vpop.eup %2970 }
 0xb92   :  { %v1754_v3 = vsel %vm299_vm3, %v2971_v2, 0.0 }
 0xb93   :  { %1755 = vadd.xlane.f32.xlu1 %v1754_v3  ;;  %v2905_v3 = vpack.c.bf16 %v2300_v1, %v2299_v0  ;;  %v2504_v0 = vld [vmem:[%s3553_s11] ss:$0 sm:$0xff] }
 0xba4   :  { %1911 = vrot.lane.b32.xlu1 %v3302_v37, %s3014_s1  ;;  %v2497_v37 = vld [vmem:[%s3546_s4] ss:$0 sm:$0xff]  ;;  %s2450_s4 = sshll.u32 %s3016_s0, 4  ;;  %s2451_s4 = int_to_ptr.vmem [resolvable:$true] %s2450_s4 }
 0xba5   :  { %v2156_v15 = vadd.f32 %v2497_v37, %v3353_v25  ;;  %s2986_s19 = scalar_lea.vmem %s2451_s4, 256  ;;  %p2991_p1 = scmp.lt.s32.totalorder %s2451_s4, %s2451_s4 }
 0xba6   :  { %p2987_p0 = scmp.ne.s32.totalorder %s2451_s4, %s2986_s19  ;;  %p2992_p2 = scmp.lt.s32.totalorder %s2986_s19, %s2986_s19 }
 0xba7   :  { %v2158_v22 = vadd.f32 %v2156_v15, %v3118_v13  ;;  %v2307_v15 = vld [vmem:[%s3551_s9 + $0x40] sm:$0xff] }
 0xba8   :  { %p2993_p3 = por %p2992_p2, %p2991_p1 }
 0xba9   :  { %v2162_v23 = vsel %vm60_vm0, %v2158_v22, 0.0 }
 0xbaa   :  { %p2994_p4 = pnand %p2993_p3, %p2987_p0 }
 0xc20   :  { %v1756_v4 = vpop.xlane.xlu1 %1755 }
 0xc21   :  { %2972 = vrcp.f32 %v1756_v4  ;;  %v2302_v4 = vld [vmem:[%s3551_s9 + $0x18] sm:$0xff] }
 0xc24   :  { %v1912_v52 = vpop.permute.xlu1 %1911 }
 0xc2b   :  { %v2973_v5 = vpop.eup %2972 }
 0xc2c   :  { %v1758_v6 = vmul.f32 %v2973_v5, %v2971_v2  ;;  %v2301_v2 = vld [vmem:[%s3551_s9 + $0x10] sm:$0xff] }
 0xc2d   :  { %v2909_v5 = vpack.c.bf16 %v2302_v4, %v2301_v2  ;;  %v2505_v2 = vld [vmem:[%s3554_s12] ss:$0 sm:$0xff] }
 0xc2e   :  { %2753 = vmatmul.mubr.msk.f32.vlgmr.msra.gmra.mrb[28].mxu0 %vm299_vm3, %v1758_v6  ;;  %v2303_v6 = vld [vmem:[%s3551_s9 + $0x20] sm:$0xff] }
 0xc2f   :  { %2767 = vmatpush3.xpose.msk.msra.mxu0 %vm60_vm0, %v1912_v52  ;;  %2768 = vmatprep.mubr.msk.f32.mxu0 %vm3011_vm1, %v3010_v7  ;;  %v2304_v52 = vld [vmem:[%s3551_s9 + $0x28] sm:$0xff] }
 0xc30   :  { %2771 = vmatprep.subr.mxu0 %v3010_v7 }
 0xc32   :  { %2769 = vmatmul.mubr.msk.f32.vlgmr.msra.gmra.mrb[30].mxu0 %vm60_vm0, %v1910_v10  ;;  %v2913_v10 = vpack.c.bf16 %v2304_v52, %v2303_v6 }
 0xc33   :  { %2773 = vmatprep.mubr.msk.f32.mxu0 %vm3011_vm1, %v3010_v7 }
 0xd01   :  { %v1831_v12 = vpop.f32.mrb[28].mxu0 }
 0xd02   :  { %v2754_v14 = vpop.f32.mrb[29].mxu0  ;;  %2764 = vmatmul.mubr.msk.f32.vlgmr.msra.gmra.mrb[16].mxu1 %vm60_vm0, %v1831_v12  ;;  %v2306_v12 = vld [vmem:[%s3551_s9 + $0x38] sm:$0xff] }
 0xd03   :  { %2893 = vmatpush3.bf16.msra.mxu1 %v3315_v61  ;;  %2784 = vmatprep.mubr.msk.f32.mxu1 %vm3011_vm1, %v3010_v7 }
 0xd04   :  { %2894 = vmatprep.subr.bf16.mxu1 %v3015_v8 }
 0xd05   :  { %v1983_v16 = vpop.f32.mrb[30].mxu0 }
 0xd06   :  { %v1987_v18 = vsel %vm219_vm2, -1e+09, %v1983_v16  ;;  %v2770_v20 = vpop.f32.mrb[31].mxu0  ;;  %v2308_v16 = vld [vmem:[%s3551_s9 + $0x48] sm:$0xff] }
 0xd07   :  { %v1988_v21 = vsel %vm299_vm3, %v1987_v18, -inf  ;;  %2896 = vmatpush3.bf16.msra.mxu1 %v3321_v62  ;;  %v2309_v20 = vld [vmem:[%s3551_s9 + $0x50] sm:$0xff] }
 0xd08   :  { %1989 = vmax.xlane.f32.xlu1 %v1988_v21  ;;  %2906 = vmatprep.subr.bf16.mxu1 %v2905_v3  ;;  %v2310_v21 = vld [vmem:[%s3551_s9 + $0x58] sm:$0xff] }
 0xd0c   :  { %2163 = vadd.xlane.f32.xlu1 %v2162_v23  ;;  %v2311_v23 = vld [vmem:[%s3551_s9 + $0x60] sm:$0xff] }
 0xd95   :  { %v1990_v61 = vpop.xlane.xlu1 %1989 }
 0xd96   :  { %v1991_v25 = vsub.f32 %v1987_v18, %v1990_v61  ;;  %v2921_v18 = vpack.c.bf16 %v2308_v16, %v2307_v15  ;;  %v2312_v61 = vld [vmem:[%s3551_s9 + $0x68] sm:$0xff] }
 0xd98   :  { %v1992_v7 = vmul.f32 1.442695, %v1991_v25  ;;  %v2929_v25 = vpack.c.bf16 %v2312_v61, %v2311_v23 }
 0xd99   :  { %v2164_v34 = vpop.xlane.xlu1 %2163 }
 0xd9a   :  { %2974 = vpow2.f32 %v1992_v7  ;;  %v2169_v38 = vmul.f32 0.03125, %v2164_v34 }
 0xd9c   :  { %v2171_v42 = vsub.f32 %v2158_v22, %v2169_v38  ;;  %v2925_v22 = vpack.c.bf16 %v2310_v21, %v2309_v20 }
 0xd9e   :  { %v2173_v46 = vmul.f32 %v2171_v42, %v2171_v42 }
 0xda0   :  { %v2175_v47 = vsel %vm60_vm0, %v2173_v46, 0.0 }
 0xda4   :  { %v2975_v8 = vpop.eup %2974 }
 0xda5   :  { %v1994_v26 = vsel %vm299_vm3, %v2975_v8, 0.0 }
 0xda6   :  { %1995 = vadd.xlane.f32.xlu0 %v1994_v26 }
 0xdbc   :  { %1999 = vrot.lane.b32.xlu0 %v3182_v36, %s3014_s1 }
 0xdd5   :  { %v1904_v31 = vpop.f32.mrb[16].mxu1 }
 0xdd6   :  { %v1908_v27 = vadd.f32 %v1904_v31, %v1666_v58  ;;  %v2765_v13 = vpop.f32.mrb[17].mxu1 }
 0xe33   :  { %v1996_v9 = vpop.xlane.xlu0 %1995 }
 0xe34   :  { %2976 = vrcp.f32 %v1996_v9 }
 0xe37   :  { %v2000_v62 = vpop.permute.xlu0 %1999 }
 0xe38   :  { %2772 = vmatpush3.msra.mxu0 %v2000_v62  ;;  %v2313_v62 = vld [vmem:[%s3551_s9 + $0x70] sm:$0xff] }
 0xe39   :  { %2898 = vmatprep.subr.bf16.mxu0 %v2897_v30 }
 0xe3e   :  { %v2977_v28 = vpop.eup %2976 }
 0xe3f   :  { %v1998_v32 = vmul.f32 %v2977_v28, %v2975_v8  ;;  %v2314_v28 = vld [vmem:[%s3551_s9 + $0x78] sm:$0xff] }
 0xe41   :  { %2774 = vmatmul.mubr.msk.f32.vlgmr.msra.gmra.mrb[32].mxu0 %vm299_vm3, %v1998_v32  ;;  %v2933_v32 = vpack.c.bf16 %v2314_v28, %v2313_v62 }
 0xe42   :  { %2900 = vmatpush3.bf16.msra.mxu0 %v2897_v30 }
 0xe43   :  { %2902 = vmatprep.subr.bf16.mxu0 %v2901_v63 }
 0xe46   :  { %2904 = vmatpush3.bf16.msra.mxu0 %v2901_v63 }
 0xf14   :  { %v2071_v33 = vpop.f32.mrb[32].mxu0 }
 0xf15   :  { %v2775_v11 = vpop.f32.mrb[33].mxu0  ;;  %2785 = vmatmul.mubr.msk.f32.vlgmr.msra.gmra.mrb[18].mxu1 %vm60_vm0, %v2071_v33  ;;  %v2500_v33 = vld [vmem:[%s3550_s8] ss:$0 sm:$0xff] }
 0xf16   :  { %2908 = vmatpush3.bf16.msra.mxu1 %v2905_v3 }
 0xf17   :  { %2910 = vmatprep.subr.bf16.mxu1 %v2909_v5 }
 0xf1a   :  { %2912 = vmatpush3.bf16.msra.mxu1 %v2909_v5 }
 0xf1b   :  { %2914 = vmatprep.subr.bf16.mxu1 %v2913_v10 }
 0xf1e   :  { %2916 = vmatpush3.bf16.msra.mxu1 %v2913_v10 }
 0xfe8   :  { %v2144_v39 = vpop.f32.mrb[18].mxu1 }
 0xfe9   :  { %v2148_v41 = vadd.f32 %v2144_v39, %v1908_v27  ;;  %v2786_v36 = vpop.f32.mrb[19].mxu1 }
 0xfeb   :  { %v2157_v43 = vadd.f32 %v2497_v37, %v2148_v41  ;;  %v2305_v37 = vld [vmem:[%s3551_s9 + $0x30] sm:$0xff] }
 0xfec   :  { %v2917_v14 = vpack.c.bf16 %v2306_v12, %v2305_v37 }
 0xfed   :  { %v2159_v44 = vadd.f32 %v2157_v43, %v3134_v17 }
 0xfee   :  { %2918 = vmatprep.subr.bf16.mxu1 %v2917_v14 }
 0xfef   :  { %v2165_v45 = vsel %vm60_vm0, %v2159_v44, 0.0  ;;  %2920 = vmatpush3.bf16.msra.mxu1 %v2917_v14 }
 0xff0   :  { %2166 = vadd.xlane.f32.xlu1 %v2165_v45  ;;  %2922 = vmatprep.subr.bf16.mxu1 %v2921_v18 }
 0xff3   :  { %2924 = vmatpush3.bf16.msra.mxu1 %v2921_v18 }
 0xff4   :  { %2176 = vadd.xlane.f32.xlu1 %v2175_v47  ;;  %2926 = vmatprep.subr.bf16.mxu1 %v2925_v22 }
 0xff7   :  { %2928 = vmatpush3.bf16.msra.mxu1 %v2925_v22 }
 0xff8   :  { %2930 = vmatprep.subr.bf16.mxu1 %v2929_v25 }
 0xffb   :  { %2932 = vmatpush3.bf16.msra.mxu1 %v2929_v25 }
 0xffc   :  { %2934 = vmatprep.subr.bf16.mxu1 %v2933_v32 }
 0xfff   :  { %2936 = vmatpush3.bf16.msra.mxu1 %v2933_v32 }
0x107d   :  { %v2167_v48 = vpop.xlane.xlu1 %2166 }
0x107e   :  { %v2170_v49 = vmul.f32 0.03125, %v2167_v48 }
0x1080   :  { %v3434_v50 = vsub.f32 %v2159_v44, %v2170_v49 }
0x1081   :  { %v2177_v51 = vpop.xlane.xlu1 %2176 }
0x1082   :  { %v2181_v53 = vmul.f32 0.03125, %v2177_v51  ;;  %v2174_v54 = vmul.f32 %v3434_v50, %v3434_v50 }
0x1084   :  { %v2183_v55 = vadd.f32 1e-05, %v2181_v53  ;;  %v2178_v19 = vsel %vm60_vm0, %v2174_v54, 0.0 }
0x1085   :  { %2179 = vadd.xlane.f32.xlu1 %v2178_v19 }
0x1086   :  { %2978 = vrsqrt.f32 %v2183_v55 }
0x1090   :  { %v2979_v17 = vpop.eup %2978 }
0x1091   :  { %v2187_v56 = vmul.f32 %v2979_v17, %v2171_v42  ;;  %v2503_v42 = vld [vmem:[%s3552_s10] ss:$0 sm:$0xff] }
0x1093   :  { %v2195_v58 = vmul.f32 %v2498_v24, %v2187_v56 }
0x1095   :  { %v3445_v29 = vadd.f32 %v2499_v57, %v2195_v58 }
0x1097   :  { %2795 = vmatprep.mubr.msk.f32.mxu0 %vm60_vm0, %v3445_v29 }
0x1112   :  { %v2180_v7 = vpop.xlane.xlu1 %2179 }
0x1113   :  { %v2182_v8 = vmul.f32 0.03125, %v2180_v7 }
0x1115   :  { %v2184_v26 = vadd.f32 1e-05, %v2182_v8 }
0x1117   :  { %2980 = vrsqrt.f32 %v2184_v26 }
0x1121   :  { %v2981_v31 = vpop.eup %2980 }
0x1122   :  { %v2188_v27 = vmul.f32 %v2981_v31, %v3434_v50 }
0x1124   :  { %v2196_v13 = vmul.f32 %v2498_v24, %v2188_v27 }
0x1126   :  { %v2204_v9 = vadd.f32 %v2499_v57, %v2196_v13 }
0x1128   :  { %2796 = vmatmul.mubr.msk.f32.vlgmr.msra.gmra.mrb[34].mxu0 %vm60_vm0, %v2204_v9 }
0x11fb   :  { %v2797_v11 = vpop.f32.mrb[34].mxu0 }
0x11fc   :  { %v2294_v34 = vadd.f32 %v2797_v11, %v2500_v33  ;;  %v2288_v38 = vpop.f32.mrb[35].mxu0 }
0x11fd   :  { %v2289_v39 = vadd.f32 %v2500_v33, %v2288_v38 }
0x11fe   :  { %v2298_v36 = vmax.f32 %v2294_v34, 0.0 }
0x11ff   :  { %v2297_v41 = vmax.f32 %v2289_v39, 0.0 }
0x1201   :  { %2830 = vmatprep.mubr.f32.mxu1 %v2297_v41 }
0x1202   :  { %2831 = vmatmul.mubr.f32.vlgmr.msra.gmra.mrb[20].mxu1 %v2298_v36 }
0x12d5   :  { %v2832_v43 = vpop.f32.mrb[20].mxu1 }
0x12d6   :  { %v2388_v44 = vpop.f32.mrb[21].mxu1  ;;  %v2394_v45 = vadd.f32 %v2832_v43, %v2503_v42 }
0x12d7   :  { %v2389_v46 = vadd.f32 %v2503_v42, %v2388_v44 }
0x12d8   :  { %v2398_v49 = vadd.f32 %v2394_v45, %v2204_v9 }
0x12d9   :  { %v2397_v47 = vadd.f32 %v2389_v46, %v3445_v29 }
0x12da   :  { %v2404_v50 = vsel %vm60_vm0, %v2398_v49, 0.0 }
0x12db   :  { %v2401_v48 = vsel %vm60_vm0, %v2397_v47, 0.0 }
0x12dc   :  { %2402 = vadd.xlane.f32.xlu1 %v2401_v48 }
0x12e0   :  { %2405 = vadd.xlane.f32.xlu1 %v2404_v50 }
0x1369   :  { %v2403_v51 = vpop.xlane.xlu1 %2402 }
0x136a   :  { %v2407_v53 = vmul.f32 0.03125, %v2403_v51 }
0x136c   :  { %v2409_v54 = vsub.f32 %v2397_v47, %v2407_v53 }
0x136d   :  { %v2406_v55 = vpop.xlane.xlu1 %2405 }
0x136e   :  { %v2408_v19 = vmul.f32 0.03125, %v2406_v55  ;;  %v2411_v17 = vmul.f32 %v2409_v54, %v2409_v54 }
0x1370   :  { %v2410_v24 = vsub.f32 %v2398_v49, %v2408_v19  ;;  %v2413_v56 = vsel %vm60_vm0, %v2411_v17, 0.0 }
0x1371   :  { %2414 = vadd.xlane.f32.xlu0 %v2413_v56 }
0x1372   :  { %v2412_v57 = vmul.f32 %v2410_v24, %v2410_v24 }
0x1374   :  { %v2416_v58 = vsel %vm60_vm0, %v2412_v57, 0.0 }
0x1375   :  { %2417 = vadd.xlane.f32.xlu1 %v2416_v58 }
0x13fe   :  { %v2415_v29 = vpop.xlane.xlu0 %2414 }
0x13ff   :  { %v2419_v59 = vmul.f32 0.03125, %v2415_v29 }
0x1401   :  { %v2421_v60 = vadd.f32 1e-05, %v2419_v59 }
0x1402   :  { %v2418_v30 = vpop.xlane.xlu1 %2417 }
0x1403   :  { %2982 = vrsqrt.f32 %v2421_v60  ;;  %v2420_v35 = vmul.f32 0.03125, %v2418_v30 }
0x1405   :  { %v2422_v40 = vadd.f32 1e-05, %v2420_v35 }
0x1407   :  { %2984 = vrsqrt.f32 %v2422_v40 }
0x140d   :  { %v2983_v63 = vpop.eup %2982 }
0x140e   :  { %v2425_v1 = vmul.f32 %v2983_v63, %v2409_v54 }
0x1410   :  { %v2433_v3 = vmul.f32 %v2504_v0, %v2425_v1 }
0x1411   :  { %v2985_v4 = vpop.eup %2984 }
0x1412   :  { %v2426_v5 = vmul.f32 %v2985_v4, %v2410_v24  ;;  %v2441_v6 = vadd.f32 %v2505_v2, %v2433_v3 }
0x1414   :  { %v2434_v52 = vmul.f32 %v2504_v0, %v2426_v5  ;;  %2443 = vst.msk [vmem:[#allocation2] sm:$0xff] %vm60_vm0, %v2441_v6 }
0x1416   :  { %v2442_v10 = vadd.f32 %v2505_v2, %v2434_v52 }
0x1418   :  { %2444 = vst.msk [vmem:[#allocation2 + $0x8] sm:$0xff] %vm60_vm0, %v2442_v10 }
0x1419   :  { %2997 = shalt.err (!%p2994_p4)
}
0x141a   :  { %s2998_s1 = scalar_lea.hbm %s3555_s13, 256 }
0x141b   :  { %p2999_p5 = scmp.ne.s32.totalorder %s3555_s13, %s2998_s1  ;;  %p3002_p6 = scmp.lt.u32.totalorder %s2998_s1, %s3555_s13 }
0x141d   :  { %p3004_p7 = pnand %p3002_p6, %p2999_p5 }
0x141f   :  { %3007 = shalt.err (!%p3004_p7)
}
0x1420   :  { %s3017_s23 = smov 128   ;;  %s3018_s5 = smov 8  }
0x1421   :  { %2456 = dma.vmem_to_hbm [thread:$0]  %s2451_s4, 256, %s3555_s13, [#allocation3], %s3017_s23, %s3017_s23, %s3018_s5  }
0x1422   :  { %3008 = dma.done.wait [#allocation3], 256  }
0x1423   :  { %3009 = vsyncadd [#allocation3], 4294967040 }
0x1424   :  { %2460 = vsyncpa [#allocation3], 1 }

</bundles_post_ra>
